<compile_context>
chip_gen: v6e
topology: v6e:2x2x1
jax: 0.10.0
libtpu: 0.0.40
codegen_flags: <defaults>
</compile_context>

<pallas_src>
import jax
import jax.numpy as jnp
from jax import lax
from jax.experimental import pallas as pl
from jax.experimental.pallas import tpu as pltpu

HIDDEN = 32
INPUT = 1
NUM_LAYERS = 2   # hard-wired to 2 stacked cells in the kernel below
OUTPUT = 5


def _lstm_kernel(pre0_ref, whh0_ref, w1_ref, b1_ref, wfc_ref, bfc_ref, out_ref):
    """Single invocation processes the entire sequence.

    pre0_ref : (seq, batch, 4H)  precomputed x @ W_ih0^T + (b_ih0 + b_hh0)
    whh0_ref : (H, 4H)           layer-0 recurrent weights (pre-transposed)
    w1_ref   : (2H, 4H)          [W_ih1 ; W_hh1] stacked along the K dim
    b1_ref   : (1, 4H)           layer-1 combined bias
    wfc_ref  : (H, O),  bfc_ref : (1, O)
    out_ref  : (batch, O)
    """
    H = HIDDEN
    seq, batch, _ = pre0_ref.shape

    # Hoist weight loads / bias broadcast out of the recurrent loop
    # (JAX does not CSE broadcast_in_dim inside loops).
    whh0 = whh0_ref[...]
    w1 = w1_ref[...]
    b1 = jnp.broadcast_to(b1_ref[...], (batch, 4 * H))

    def gates_to_hc(gates, c_prev):
        # PyTorch gate order: i, f, g, o
        i = jax.nn.sigmoid(gates[:, 0 * H:1 * H])
        f = jax.nn.sigmoid(gates[:, 1 * H:2 * H])
        g = jnp.tanh(gates[:, 2 * H:3 * H])
        o = jax.nn.sigmoid(gates[:, 3 * H:4 * H])
        c_new = f * c_prev + i * g
        h_new = o * jnp.tanh(c_new)
        return h_new, c_new

    def step(t, carry):
        h1, c1, h2, c2 = carry
        # layer 0: only the recurrent matmul sits on the serial path
        g0 = pre0_ref[t] + jnp.dot(h1, whh0, preferred_element_type=jnp.float32)
        h1, c1 = gates_to_hc(g0, c1)
        # layer 1: input + recurrent matmuls fused into one (batch,2H)@(2H,4H)
        hx = jnp.concatenate([h1, h2], axis=1)
        g1 = jnp.dot(hx, w1, preferred_element_type=jnp.float32) + b1
        h2, c2 = gates_to_hc(g1, c2)
        return (h1, c1, h2, c2)

    z = jnp.zeros((batch, H), jnp.float32)
    _, _, h2, _ = lax.fori_loop(0, seq, step, (z, z, z, z), unroll=True)

    # FC head computed once, on the last timestep's hidden state.
    out_ref[...] = (jnp.dot(h2, wfc_ref[...], preferred_element_type=jnp.float32)
                    + bfc_ref[...])


def lstm_forward(x, params):
    """x: (batch, seq, input_size) float32, batch_first like the PyTorch module."""
    batch, seq, in_sz = x.shape
    assert in_sz == INPUT
    wih0, whh0, b0, wih1, whh1, b1, wfc, bfc = params

    # time-major + hoist the layer-0 input projection out of the recurrence
    x_tm = jnp.transpose(x, (1, 0, 2))                          # (seq, batch, I)
    pre0 = (jnp.einsum('sbi,ig->sbg', x_tm, wih0) + b0).astype(jnp.float32)
    # stack layer-1 input/recurrent weights along K -> one matmul per step
    w1 = jnp.concatenate([wih1, whh1], axis=0)                  # (2H, 4H)

    def full(shape):
        return pl.BlockSpec(shape, lambda i, _n=len(shape): (0,) * _n)

    return pl.pallas_call(
        _lstm_kernel,
        out_shape=jax.ShapeDtypeStruct((batch, OUTPUT), jnp.float32),
        grid_spec=pltpu.PrefetchScalarGridSpec(
            num_scalar_prefetch=0,
            grid=(1,),                     # everything resident; loop is in-kernel
            in_specs=[
                full(pre0.shape), full(whh0.shape), full(w1.shape),
                full(b1.shape), full(wfc.shape), full(bfc.shape),
            ],
            out_specs=pl.BlockSpec((batch, OUTPUT), lambda i: (0, 0)),
        ),
        compiler_params=pltpu.CompilerParams(
            dimension_semantics=("arbitrary",)),
    )(pre0, whh0, w1, b1, wfc, bfc)


def init_params(key):
    """Deterministic init mirroring PyTorch default U(-k, k) shapes for
    nn.LSTM(1, 32, 2, batch_first=True) and nn.Linear(32, 5)."""
    H, I, O = HIDDEN, INPUT, OUTPUT
    k_lstm = 1.0 / jnp.sqrt(jnp.float32(H))
    k_fc = 1.0 / jnp.sqrt(jnp.float32(H))
    keys = jax.random.split(key, 10)
    u = lambda k, shape, s: jax.random.uniform(k, shape, jnp.float32, -s, s)

    # layer 0
    w_ih_l0 = u(keys[0], (4 * H, I), k_lstm)
    w_hh_l0 = u(keys[1], (4 * H, H), k_lstm)
    b_ih_l0 = u(keys[2], (4 * H,), k_lstm)
    b_hh_l0 = u(keys[3], (4 * H,), k_lstm)
    # layer 1
    w_ih_l1 = u(keys[4], (4 * H, H), k_lstm)
    w_hh_l1 = u(keys[5], (4 * H, H), k_lstm)
    b_ih_l1 = u(keys[6], (4 * H,), k_lstm)
    b_hh_l1 = u(keys[7], (4 * H,), k_lstm)
    # fc
    w_fc = u(keys[8], (O, H), k_fc)
    b_fc = u(keys[9], (O,), k_fc)

    return (
        w_ih_l0.T,                              # (I, 4H)
        w_hh_l0.T,                              # (H, 4H)
        (b_ih_l0 + b_hh_l0).reshape(1, 4 * H),  # (1, 4H)
        w_ih_l1.T,                              # (H, 4H)
        w_hh_l1.T,                              # (H, 4H)
        (b_ih_l1 + b_hh_l1).reshape(1, 4 * H),  # (1, 4H)
        w_fc.T,                                 # (H, O)
        b_fc.reshape(1, O),                     # (1, O)
    )


def lstm_reference(x, params):
    """Pure-JAX reference of the same forward pass (for correctness check)."""
    wih0, whh0, b0, wih1, whh1, b1, wfc, bfc = params
    H = HIDDEN
    batch, seq, _ = x.shape
    h1 = c1 = h2 = c2 = jnp.zeros((batch, H), jnp.float32)

    def cell(inp, w_ih, w_hh, b, h, c):
        g = inp @ w_ih + h @ w_hh + b
        i = jax.nn.sigmoid(g[:, 0 * H:1 * H])
        f = jax.nn.sigmoid(g[:, 1 * H:2 * H])
        gg = jnp.tanh(g[:, 2 * H:3 * H])
        o = jax.nn.sigmoid(g[:, 3 * H:4 * H])
        c = f * c + i * gg
        h = o * jnp.tanh(c)
        return h, c

    for t in range(seq):
        h1, c1 = cell(x[:, t, :], wih0, whh0, b0, h1, c1)
        h2, c2 = cell(h1, wih1, whh1, b1, h2, c2)
    return h2 @ wfc + bfc


if __name__ == "__main__":
    key = jax.random.PRNGKey(0)
    k_param, k_x = jax.random.split(key)

    batch, seq = 2, 8
    x = jax.random.normal(k_x, (batch, seq, INPUT), jnp.float32)
    params = init_params(k_param)

    out = lstm_forward(x, params)
    out = jax.block_until_ready(out)

    ref = lstm_reference(x, params)
    assert out.shape == (batch, OUTPUT)
    assert jnp.allclose(out, ref, atol=1e-4, rtol=1e-4), (out, ref)

    print("KERNEL_OK")
</pallas_src>

<mosaic_0001>
module attributes {stable_mosaic.version = 11 : i64} {
  func.func @_lstm_kernel(%arg0: i32, %arg1: memref<8x2x128xf32, #tpu.memory_space<vmem>>, %arg2: memref<32x128xf32, #tpu.memory_space<vmem>>, %arg3: memref<64x128xf32, #tpu.memory_space<vmem>>, %arg4: memref<1x128xf32, #tpu.memory_space<vmem>>, %arg5: memref<32x5xf32, #tpu.memory_space<vmem>>, %arg6: memref<1x5xf32, #tpu.memory_space<vmem>>, %arg7: memref<2x5xf32, #tpu.memory_space<vmem>>) attributes {dimension_semantics = [#tpu.dimension_semantics<arbitrary>], iteration_bounds = array<i64: 1>, scalar_prefetch = 0 : i64, scratch_operands = 0 : i64, tpu.core_type = #tpu.core_type<tc>, window_params = [{pipeline_mode = #tpu.pipeline_mode<synchronous>, transform_indices = @transform_0, window_bounds = array<i64: 8, 2, 128>}, {pipeline_mode = #tpu.pipeline_mode<synchronous>, transform_indices = @transform_1, window_bounds = array<i64: 32, 128>}, {pipeline_mode = #tpu.pipeline_mode<synchronous>, transform_indices = @transform_2, window_bounds = array<i64: 64, 128>}, {pipeline_mode = #tpu.pipeline_mode<synchronous>, transform_indices = @transform_3, window_bounds = array<i64: 1, 128>}, {pipeline_mode = #tpu.pipeline_mode<synchronous>, transform_indices = @transform_4, window_bounds = array<i64: 32, 5>}, {pipeline_mode = #tpu.pipeline_mode<synchronous>, transform_indices = @transform_5, window_bounds = array<i64: 1, 5>}, {pipeline_mode = #tpu.pipeline_mode<synchronous>, transform_indices = @transform_6, window_bounds = array<i64: 2, 5>}]} {
    %c0 = arith.constant 0 : index
    %c0_0 = arith.constant 0 : index
    %0 = vector.load %arg2[%c0, %c0_0] : memref<32x128xf32, #tpu.memory_space<vmem>>, vector<32x128xf32>
    %c0_1 = arith.constant 0 : index
    %c0_2 = arith.constant 0 : index
    %1 = vector.load %arg3[%c0_1, %c0_2] : memref<64x128xf32, #tpu.memory_space<vmem>>, vector<64x128xf32>
    %c0_3 = arith.constant 0 : index
    %c0_4 = arith.constant 0 : index
    %2 = vector.load %arg4[%c0_3, %c0_4] : memref<1x128xf32, #tpu.memory_space<vmem>>, vector<1x128xf32>
    %3 = vector.shape_cast %2 : vector<1x128xf32> to vector<1x128xf32>
    %4 = vector.broadcast %3 : vector<1x128xf32> to vector<2x128xf32>
    %cst = arith.constant 0.000000e+00 : f32
    %5 = vector.broadcast %cst : f32 to vector<2x32xf32>
    %c0_i32 = arith.constant 0 : i32
    %6 = arith.index_cast %c0_i32 : i32 to index
    %c0_5 = arith.constant 0 : index
    %c0_6 = arith.constant 0 : index
    %7 = vector.load %arg1[%6, %c0_5, %c0_6] : memref<8x2x128xf32, #tpu.memory_space<vmem>>, vector<1x2x128xf32>
    %8 = vector.shape_cast %7 : vector<1x2x128xf32> to vector<2x128xf32>
    %cst_7 = arith.constant dense<0.000000e+00> : vector<2x128xf32>
    %9 = tpu.matmul %5, %0, %cst_7 {dimension_numbers = #tpu.dot_dimension_numbers<[1], [0], [0], [1], [0, 0, 1, 1], [], []>} : vector<2x32xf32>, vector<32x128xf32>, vector<2x128xf32> -> vector<2x128xf32>
    %10 = arith.addf %8, %9 : vector<2x128xf32>
    %11 = vector.extract_strided_slice %10 {offsets = [0, 0], sizes = [2, 32], strides = [1, 1]} : vector<2x128xf32> to vector<2x32xf32>
    %12 = arith.negf %11 : vector<2x32xf32>
    %13 = math.exp %12 : vector<2x32xf32>
    %cst_8 = arith.constant 1.000000e+00 : f32
    %14 = vector.broadcast %cst_8 : f32 to vector<2x32xf32>
    %15 = arith.addf %14, %13 : vector<2x32xf32>
    %16 = arith.divf %14, %15 : vector<2x32xf32>
    %17 = vector.extract_strided_slice %10 {offsets = [0, 32], sizes = [2, 32], strides = [1, 1]} : vector<2x128xf32> to vector<2x32xf32>
    %18 = arith.negf %17 : vector<2x32xf32>
    %19 = math.exp %18 : vector<2x32xf32>
    %cst_9 = arith.constant 1.000000e+00 : f32
    %20 = vector.broadcast %cst_9 : f32 to vector<2x32xf32>
    %21 = arith.addf %20, %19 : vector<2x32xf32>
    %22 = arith.divf %20, %21 : vector<2x32xf32>
    %23 = vector.extract_strided_slice %10 {offsets = [0, 64], sizes = [2, 32], strides = [1, 1]} : vector<2x128xf32> to vector<2x32xf32>
    %24 = math.tanh %23 : vector<2x32xf32>
    %25 = vector.extract_strided_slice %10 {offsets = [0, 96], sizes = [2, 32], strides = [1, 1]} : vector<2x128xf32> to vector<2x32xf32>
    %26 = arith.negf %25 : vector<2x32xf32>
    %27 = math.exp %26 : vector<2x32xf32>
    %cst_10 = arith.constant 1.000000e+00 : f32
    %28 = vector.broadcast %cst_10 : f32 to vector<2x32xf32>
    %29 = arith.addf %28, %27 : vector<2x32xf32>
    %30 = arith.divf %28, %29 : vector<2x32xf32>
    %31 = arith.mulf %22, %5 : vector<2x32xf32>
    %32 = arith.mulf %16, %24 : vector<2x32xf32>
    %33 = arith.addf %31, %32 : vector<2x32xf32>
    %34 = math.tanh %33 : vector<2x32xf32>
    %35 = arith.mulf %30, %34 : vector<2x32xf32>
    %36 = tpu.concatenate %35, %5 in 1 : vector<2x32xf32>, vector<2x32xf32> -> vector<2x64xf32>
    %cst_11 = arith.constant dense<0.000000e+00> : vector<2x128xf32>
    %37 = tpu.matmul %36, %1, %cst_11 {dimension_numbers = #tpu.dot_dimension_numbers<[1], [0], [0], [1], [0, 0, 1, 1], [], []>} : vector<2x64xf32>, vector<64x128xf32>, vector<2x128xf32> -> vector<2x128xf32>
    %38 = arith.addf %37, %4 : vector<2x128xf32>
    %39 = vector.extract_strided_slice %38 {offsets = [0, 0], sizes = [2, 32], strides = [1, 1]} : vector<2x128xf32> to vector<2x32xf32>
    %40 = arith.negf %39 : vector<2x32xf32>
    %41 = math.exp %40 : vector<2x32xf32>
    %cst_12 = arith.constant 1.000000e+00 : f32
    %42 = vector.broadcast %cst_12 : f32 to vector<2x32xf32>
    %43 = arith.addf %42, %41 : vector<2x32xf32>
    %44 = arith.divf %42, %43 : vector<2x32xf32>
    %45 = vector.extract_strided_slice %38 {offsets = [0, 32], sizes = [2, 32], strides = [1, 1]} : vector<2x128xf32> to vector<2x32xf32>
    %46 = arith.negf %45 : vector<2x32xf32>
    %47 = math.exp %46 : vector<2x32xf32>
    %cst_13 = arith.constant 1.000000e+00 : f32
    %48 = vector.broadcast %cst_13 : f32 to vector<2x32xf32>
    %49 = arith.addf %48, %47 : vector<2x32xf32>
    %50 = arith.divf %48, %49 : vector<2x32xf32>
    %51 = vector.extract_strided_slice %38 {offsets = [0, 64], sizes = [2, 32], strides = [1, 1]} : vector<2x128xf32> to vector<2x32xf32>
    %52 = math.tanh %51 : vector<2x32xf32>
    %53 = vector.extract_strided_slice %38 {offsets = [0, 96], sizes = [2, 32], strides = [1, 1]} : vector<2x128xf32> to vector<2x32xf32>
    %54 = arith.negf %53 : vector<2x32xf32>
    %55 = math.exp %54 : vector<2x32xf32>
    %cst_14 = arith.constant 1.000000e+00 : f32
    %56 = vector.broadcast %cst_14 : f32 to vector<2x32xf32>
    %57 = arith.addf %56, %55 : vector<2x32xf32>
    %58 = arith.divf %56, %57 : vector<2x32xf32>
    %59 = arith.mulf %50, %5 : vector<2x32xf32>
    %60 = arith.mulf %44, %52 : vector<2x32xf32>
    %61 = arith.addf %59, %60 : vector<2x32xf32>
    %62 = math.tanh %61 : vector<2x32xf32>
    %63 = arith.mulf %58, %62 : vector<2x32xf32>
    %c1_i32 = arith.constant 1 : i32
    %64 = arith.index_cast %c1_i32 : i32 to index
    %c0_15 = arith.constant 0 : index
    %c0_16 = arith.constant 0 : index
    %65 = vector.load %arg1[%64, %c0_15, %c0_16] : memref<8x2x128xf32, #tpu.memory_space<vmem>>, vector<1x2x128xf32>
    %66 = vector.shape_cast %65 : vector<1x2x128xf32> to vector<2x128xf32>
    %cst_17 = arith.constant dense<0.000000e+00> : vector<2x128xf32>
    %67 = tpu.matmul %35, %0, %cst_17 {dimension_numbers = #tpu.dot_dimension_numbers<[1], [0], [0], [1], [0, 0, 1, 1], [], []>} : vector<2x32xf32>, vector<32x128xf32>, vector<2x128xf32> -> vector<2x128xf32>
    %68 = arith.addf %66, %67 : vector<2x128xf32>
    %69 = vector.extract_strided_slice %68 {offsets = [0, 0], sizes = [2, 32], strides = [1, 1]} : vector<2x128xf32> to vector<2x32xf32>
    %70 = arith.negf %69 : vector<2x32xf32>
    %71 = math.exp %70 : vector<2x32xf32>
    %cst_18 = arith.constant 1.000000e+00 : f32
    %72 = vector.broadcast %cst_18 : f32 to vector<2x32xf32>
    %73 = arith.addf %72, %71 : vector<2x32xf32>
    %74 = arith.divf %72, %73 : vector<2x32xf32>
    %75 = vector.extract_strided_slice %68 {offsets = [0, 32], sizes = [2, 32], strides = [1, 1]} : vector<2x128xf32> to vector<2x32xf32>
    %76 = arith.negf %75 : vector<2x32xf32>
    %77 = math.exp %76 : vector<2x32xf32>
    %cst_19 = arith.constant 1.000000e+00 : f32
    %78 = vector.broadcast %cst_19 : f32 to vector<2x32xf32>
    %79 = arith.addf %78, %77 : vector<2x32xf32>
    %80 = arith.divf %78, %79 : vector<2x32xf32>
    %81 = vector.extract_strided_slice %68 {offsets = [0, 64], sizes = [2, 32], strides = [1, 1]} : vector<2x128xf32> to vector<2x32xf32>
    %82 = math.tanh %81 : vector<2x32xf32>
    %83 = vector.extract_strided_slice %68 {offsets = [0, 96], sizes = [2, 32], strides = [1, 1]} : vector<2x128xf32> to vector<2x32xf32>
    %84 = arith.negf %83 : vector<2x32xf32>
    %85 = math.exp %84 : vector<2x32xf32>
    %cst_20 = arith.constant 1.000000e+00 : f32
    %86 = vector.broadcast %cst_20 : f32 to vector<2x32xf32>
    %87 = arith.addf %86, %85 : vector<2x32xf32>
    %88 = arith.divf %86, %87 : vector<2x32xf32>
    %89 = arith.mulf %80, %33 : vector<2x32xf32>
    %90 = arith.mulf %74, %82 : vector<2x32xf32>
    %91 = arith.addf %89, %90 : vector<2x32xf32>
    %92 = math.tanh %91 : vector<2x32xf32>
    %93 = arith.mulf %88, %92 : vector<2x32xf32>
    %94 = tpu.concatenate %93, %63 in 1 : vector<2x32xf32>, vector<2x32xf32> -> vector<2x64xf32>
    %cst_21 = arith.constant dense<0.000000e+00> : vector<2x128xf32>
    %95 = tpu.matmul %94, %1, %cst_21 {dimension_numbers = #tpu.dot_dimension_numbers<[1], [0], [0], [1], [0, 0, 1, 1], [], []>} : vector<2x64xf32>, vector<64x128xf32>, vector<2x128xf32> -> vector<2x128xf32>
    %96 = arith.addf %95, %4 : vector<2x128xf32>
    %97 = vector.extract_strided_slice %96 {offsets = [0, 0], sizes = [2, 32], strides = [1, 1]} : vector<2x128xf32> to vector<2x32xf32>
    %98 = arith.negf %97 : vector<2x32xf32>
    %99 = math.exp %98 : vector<2x32xf32>
    %cst_22 = arith.constant 1.000000e+00 : f32
    %100 = vector.broadcast %cst_22 : f32 to vector<2x32xf32>
    %101 = arith.addf %100, %99 : vector<2x32xf32>
    %102 = arith.divf %100, %101 : vector<2x32xf32>
    %103 = vector.extract_strided_slice %96 {offsets = [0, 32], sizes = [2, 32], strides = [1, 1]} : vector<2x128xf32> to vector<2x32xf32>
    %104 = arith.negf %103 : vector<2x32xf32>
    %105 = math.exp %104 : vector<2x32xf32>
    %cst_23 = arith.constant 1.000000e+00 : f32
    %106 = vector.broadcast %cst_23 : f32 to vector<2x32xf32>
    %107 = arith.addf %106, %105 : vector<2x32xf32>
    %108 = arith.divf %106, %107 : vector<2x32xf32>
    %109 = vector.extract_strided_slice %96 {offsets = [0, 64], sizes = [2, 32], strides = [1, 1]} : vector<2x128xf32> to vector<2x32xf32>
    %110 = math.tanh %109 : vector<2x32xf32>
    %111 = vector.extract_strided_slice %96 {offsets = [0, 96], sizes = [2, 32], strides = [1, 1]} : vector<2x128xf32> to vector<2x32xf32>
    %112 = arith.negf %111 : vector<2x32xf32>
    %113 = math.exp %112 : vector<2x32xf32>
    %cst_24 = arith.constant 1.000000e+00 : f32
    %114 = vector.broadcast %cst_24 : f32 to vector<2x32xf32>
    %115 = arith.addf %114, %113 : vector<2x32xf32>
    %116 = arith.divf %114, %115 : vector<2x32xf32>
    %117 = arith.mulf %108, %61 : vector<2x32xf32>
    %118 = arith.mulf %102, %110 : vector<2x32xf32>
    %119 = arith.addf %117, %118 : vector<2x32xf32>
    %120 = math.tanh %119 : vector<2x32xf32>
    %121 = arith.mulf %116, %120 : vector<2x32xf32>
    %c2_i32 = arith.constant 2 : i32
    %122 = arith.index_cast %c2_i32 : i32 to index
    %c0_25 = arith.constant 0 : index
    %c0_26 = arith.constant 0 : index
    %123 = vector.load %arg1[%122, %c0_25, %c0_26] : memref<8x2x128xf32, #tpu.memory_space<vmem>>, vector<1x2x128xf32>
    %124 = vector.shape_cast %123 : vector<1x2x128xf32> to vector<2x128xf32>
    %cst_27 = arith.constant dense<0.000000e+00> : vector<2x128xf32>
    %125 = tpu.matmul %93, %0, %cst_27 {dimension_numbers = #tpu.dot_dimension_numbers<[1], [0], [0], [1], [0, 0, 1, 1], [], []>} : vector<2x32xf32>, vector<32x128xf32>, vector<2x128xf32> -> vector<2x128xf32>
    %126 = arith.addf %124, %125 : vector<2x128xf32>
    %127 = vector.extract_strided_slice %126 {offsets = [0, 0], sizes = [2, 32], strides = [1, 1]} : vector<2x128xf32> to vector<2x32xf32>
    %128 = arith.negf %127 : vector<2x32xf32>
    %129 = math.exp %128 : vector<2x32xf32>
    %cst_28 = arith.constant 1.000000e+00 : f32
    %130 = vector.broadcast %cst_28 : f32 to vector<2x32xf32>
    %131 = arith.addf %130, %129 : vector<2x32xf32>
    %132 = arith.divf %130, %131 : vector<2x32xf32>
    %133 = vector.extract_strided_slice %126 {offsets = [0, 32], sizes = [2, 32], strides = [1, 1]} : vector<2x128xf32> to vector<2x32xf32>
    %134 = arith.negf %133 : vector<2x32xf32>
    %135 = math.exp %134 : vector<2x32xf32>
    %cst_29 = arith.constant 1.000000e+00 : f32
    %136 = vector.broadcast %cst_29 : f32 to vector<2x32xf32>
    %137 = arith.addf %136, %135 : vector<2x32xf32>
    %138 = arith.divf %136, %137 : vector<2x32xf32>
    %139 = vector.extract_strided_slice %126 {offsets = [0, 64], sizes = [2, 32], strides = [1, 1]} : vector<2x128xf32> to vector<2x32xf32>
    %140 = math.tanh %139 : vector<2x32xf32>
    %141 = vector.extract_strided_slice %126 {offsets = [0, 96], sizes = [2, 32], strides = [1, 1]} : vector<2x128xf32> to vector<2x32xf32>
    %142 = arith.negf %141 : vector<2x32xf32>
    %143 = math.exp %142 : vector<2x32xf32>
    %cst_30 = arith.constant 1.000000e+00 : f32
    %144 = vector.broadcast %cst_30 : f32 to vector<2x32xf32>
    %145 = arith.addf %144, %143 : vector<2x32xf32>
    %146 = arith.divf %144, %145 : vector<2x32xf32>
    %147 = arith.mulf %138, %91 : vector<2x32xf32>
    %148 = arith.mulf %132, %140 : vector<2x32xf32>
    %149 = arith.addf %147, %148 : vector<2x32xf32>
    %150 = math.tanh %149 : vector<2x32xf32>
    %151 = arith.mulf %146, %150 : vector<2x32xf32>
    %152 = tpu.concatenate %151, %121 in 1 : vector<2x32xf32>, vector<2x32xf32> -> vector<2x64xf32>
    %cst_31 = arith.constant dense<0.000000e+00> : vector<2x128xf32>
    %153 = tpu.matmul %152, %1, %cst_31 {dimension_numbers = #tpu.dot_dimension_numbers<[1], [0], [0], [1], [0, 0, 1, 1], [], []>} : vector<2x64xf32>, vector<64x128xf32>, vector<2x128xf32> -> vector<2x128xf32>
    %154 = arith.addf %153, %4 : vector<2x128xf32>
    %155 = vector.extract_strided_slice %154 {offsets = [0, 0], sizes = [2, 32], strides = [1, 1]} : vector<2x128xf32> to vector<2x32xf32>
    %156 = arith.negf %155 : vector<2x32xf32>
    %157 = math.exp %156 : vector<2x32xf32>
    %cst_32 = arith.constant 1.000000e+00 : f32
    %158 = vector.broadcast %cst_32 : f32 to vector<2x32xf32>
    %159 = arith.addf %158, %157 : vector<2x32xf32>
    %160 = arith.divf %158, %159 : vector<2x32xf32>
    %161 = vector.extract_strided_slice %154 {offsets = [0, 32], sizes = [2, 32], strides = [1, 1]} : vector<2x128xf32> to vector<2x32xf32>
    %162 = arith.negf %161 : vector<2x32xf32>
    %163 = math.exp %162 : vector<2x32xf32>
    %cst_33 = arith.constant 1.000000e+00 : f32
    %164 = vector.broadcast %cst_33 : f32 to vector<2x32xf32>
    %165 = arith.addf %164, %163 : vector<2x32xf32>
    %166 = arith.divf %164, %165 : vector<2x32xf32>
    %167 = vector.extract_strided_slice %154 {offsets = [0, 64], sizes = [2, 32], strides = [1, 1]} : vector<2x128xf32> to vector<2x32xf32>
    %168 = math.tanh %167 : vector<2x32xf32>
    %169 = vector.extract_strided_slice %154 {offsets = [0, 96], sizes = [2, 32], strides = [1, 1]} : vector<2x128xf32> to vector<2x32xf32>
    %170 = arith.negf %169 : vector<2x32xf32>
    %171 = math.exp %170 : vector<2x32xf32>
    %cst_34 = arith.constant 1.000000e+00 : f32
    %172 = vector.broadcast %cst_34 : f32 to vector<2x32xf32>
    %173 = arith.addf %172, %171 : vector<2x32xf32>
    %174 = arith.divf %172, %173 : vector<2x32xf32>
    %175 = arith.mulf %166, %119 : vector<2x32xf32>
    %176 = arith.mulf %160, %168 : vector<2x32xf32>
    %177 = arith.addf %175, %176 : vector<2x32xf32>
    %178 = math.tanh %177 : vector<2x32xf32>
    %179 = arith.mulf %174, %178 : vector<2x32xf32>
    %c3_i32 = arith.constant 3 : i32
    %180 = arith.index_cast %c3_i32 : i32 to index
    %c0_35 = arith.constant 0 : index
    %c0_36 = arith.constant 0 : index
    %181 = vector.load %arg1[%180, %c0_35, %c0_36] : memref<8x2x128xf32, #tpu.memory_space<vmem>>, vector<1x2x128xf32>
    %182 = vector.shape_cast %181 : vector<1x2x128xf32> to vector<2x128xf32>
    %cst_37 = arith.constant dense<0.000000e+00> : vector<2x128xf32>
    %183 = tpu.matmul %151, %0, %cst_37 {dimension_numbers = #tpu.dot_dimension_numbers<[1], [0], [0], [1], [0, 0, 1, 1], [], []>} : vector<2x32xf32>, vector<32x128xf32>, vector<2x128xf32> -> vector<2x128xf32>
    %184 = arith.addf %182, %183 : vector<2x128xf32>
    %185 = vector.extract_strided_slice %184 {offsets = [0, 0], sizes = [2, 32], strides = [1, 1]} : vector<2x128xf32> to vector<2x32xf32>
    %186 = arith.negf %185 : vector<2x32xf32>
    %187 = math.exp %186 : vector<2x32xf32>
    %cst_38 = arith.constant 1.000000e+00 : f32
    %188 = vector.broadcast %cst_38 : f32 to vector<2x32xf32>
    %189 = arith.addf %188, %187 : vector<2x32xf32>
    %190 = arith.divf %188, %189 : vector<2x32xf32>
    %191 = vector.extract_strided_slice %184 {offsets = [0, 32], sizes = [2, 32], strides = [1, 1]} : vector<2x128xf32> to vector<2x32xf32>
    %192 = arith.negf %191 : vector<2x32xf32>
    %193 = math.exp %192 : vector<2x32xf32>
    %cst_39 = arith.constant 1.000000e+00 : f32
    %194 = vector.broadcast %cst_39 : f32 to vector<2x32xf32>
    %195 = arith.addf %194, %193 : vector<2x32xf32>
    %196 = arith.divf %194, %195 : vector<2x32xf32>
    %197 = vector.extract_strided_slice %184 {offsets = [0, 64], sizes = [2, 32], strides = [1, 1]} : vector<2x128xf32> to vector<2x32xf32>
    %198 = math.tanh %197 : vector<2x32xf32>
    %199 = vector.extract_strided_slice %184 {offsets = [0, 96], sizes = [2, 32], strides = [1, 1]} : vector<2x128xf32> to vector<2x32xf32>
    %200 = arith.negf %199 : vector<2x32xf32>
    %201 = math.exp %200 : vector<2x32xf32>
    %cst_40 = arith.constant 1.000000e+00 : f32
    %202 = vector.broadcast %cst_40 : f32 to vector<2x32xf32>
    %203 = arith.addf %202, %201 : vector<2x32xf32>
    %204 = arith.divf %202, %203 : vector<2x32xf32>
    %205 = arith.mulf %196, %149 : vector<2x32xf32>
    %206 = arith.mulf %190, %198 : vector<2x32xf32>
    %207 = arith.addf %205, %206 : vector<2x32xf32>
    %208 = math.tanh %207 : vector<2x32xf32>
    %209 = arith.mulf %204, %208 : vector<2x32xf32>
    %210 = tpu.concatenate %209, %179 in 1 : vector<2x32xf32>, vector<2x32xf32> -> vector<2x64xf32>
    %cst_41 = arith.constant dense<0.000000e+00> : vector<2x128xf32>
    %211 = tpu.matmul %210, %1, %cst_41 {dimension_numbers = #tpu.dot_dimension_numbers<[1], [0], [0], [1], [0, 0, 1, 1], [], []>} : vector<2x64xf32>, vector<64x128xf32>, vector<2x128xf32> -> vector<2x128xf32>
    %212 = arith.addf %211, %4 : vector<2x128xf32>
    %213 = vector.extract_strided_slice %212 {offsets = [0, 0], sizes = [2, 32], strides = [1, 1]} : vector<2x128xf32> to vector<2x32xf32>
    %214 = arith.negf %213 : vector<2x32xf32>
    %215 = math.exp %214 : vector<2x32xf32>
    %cst_42 = arith.constant 1.000000e+00 : f32
    %216 = vector.broadcast %cst_42 : f32 to vector<2x32xf32>
    %217 = arith.addf %216, %215 : vector<2x32xf32>
    %218 = arith.divf %216, %217 : vector<2x32xf32>
    %219 = vector.extract_strided_slice %212 {offsets = [0, 32], sizes = [2, 32], strides = [1, 1]} : vector<2x128xf32> to vector<2x32xf32>
    %220 = arith.negf %219 : vector<2x32xf32>
    %221 = math.exp %220 : vector<2x32xf32>
    %cst_43 = arith.constant 1.000000e+00 : f32
    %222 = vector.broadcast %cst_43 : f32 to vector<2x32xf32>
    %223 = arith.addf %222, %221 : vector<2x32xf32>
    %224 = arith.divf %222, %223 : vector<2x32xf32>
    %225 = vector.extract_strided_slice %212 {offsets = [0, 64], sizes = [2, 32], strides = [1, 1]} : vector<2x128xf32> to vector<2x32xf32>
    %226 = math.tanh %225 : vector<2x32xf32>
    %227 = vector.extract_strided_slice %212 {offsets = [0, 96], sizes = [2, 32], strides = [1, 1]} : vector<2x128xf32> to vector<2x32xf32>
    %228 = arith.negf %227 : vector<2x32xf32>
    %229 = math.exp %228 : vector<2x32xf32>
    %cst_44 = arith.constant 1.000000e+00 : f32
    %230 = vector.broadcast %cst_44 : f32 to vector<2x32xf32>
    %231 = arith.addf %230, %229 : vector<2x32xf32>
    %232 = arith.divf %230, %231 : vector<2x32xf32>
    %233 = arith.mulf %224, %177 : vector<2x32xf32>
    %234 = arith.mulf %218, %226 : vector<2x32xf32>
    %235 = arith.addf %233, %234 : vector<2x32xf32>
    %236 = math.tanh %235 : vector<2x32xf32>
    %237 = arith.mulf %232, %236 : vector<2x32xf32>
    %c4_i32 = arith.constant 4 : i32
    %238 = arith.index_cast %c4_i32 : i32 to index
    %c0_45 = arith.constant 0 : index
    %c0_46 = arith.constant 0 : index
    %239 = vector.load %arg1[%238, %c0_45, %c0_46] : memref<8x2x128xf32, #tpu.memory_space<vmem>>, vector<1x2x128xf32>
    %240 = vector.shape_cast %239 : vector<1x2x128xf32> to vector<2x128xf32>
    %cst_47 = arith.constant dense<0.000000e+00> : vector<2x128xf32>
    %241 = tpu.matmul %209, %0, %cst_47 {dimension_numbers = #tpu.dot_dimension_numbers<[1], [0], [0], [1], [0, 0, 1, 1], [], []>} : vector<2x32xf32>, vector<32x128xf32>, vector<2x128xf32> -> vector<2x128xf32>
    %242 = arith.addf %240, %241 : vector<2x128xf32>
    %243 = vector.extract_strided_slice %242 {offsets = [0, 0], sizes = [2, 32], strides = [1, 1]} : vector<2x128xf32> to vector<2x32xf32>
    %244 = arith.negf %243 : vector<2x32xf32>
    %245 = math.exp %244 : vector<2x32xf32>
    %cst_48 = arith.constant 1.000000e+00 : f32
    %246 = vector.broadcast %cst_48 : f32 to vector<2x32xf32>
    %247 = arith.addf %246, %245 : vector<2x32xf32>
    %248 = arith.divf %246, %247 : vector<2x32xf32>
    %249 = vector.extract_strided_slice %242 {offsets = [0, 32], sizes = [2, 32], strides = [1, 1]} : vector<2x128xf32> to vector<2x32xf32>
    %250 = arith.negf %249 : vector<2x32xf32>
    %251 = math.exp %250 : vector<2x32xf32>
    %cst_49 = arith.constant 1.000000e+00 : f32
    %252 = vector.broadcast %cst_49 : f32 to vector<2x32xf32>
    %253 = arith.addf %252, %251 : vector<2x32xf32>
    %254 = arith.divf %252, %253 : vector<2x32xf32>
    %255 = vector.extract_strided_slice %242 {offsets = [0, 64], sizes = [2, 32], strides = [1, 1]} : vector<2x128xf32> to vector<2x32xf32>
    %256 = math.tanh %255 : vector<2x32xf32>
    %257 = vector.extract_strided_slice %242 {offsets = [0, 96], sizes = [2, 32], strides = [1, 1]} : vector<2x128xf32> to vector<2x32xf32>
    %258 = arith.negf %257 : vector<2x32xf32>
    %259 = math.exp %258 : vector<2x32xf32>
    %cst_50 = arith.constant 1.000000e+00 : f32
    %260 = vector.broadcast %cst_50 : f32 to vector<2x32xf32>
    %261 = arith.addf %260, %259 : vector<2x32xf32>
    %262 = arith.divf %260, %261 : vector<2x32xf32>
    %263 = arith.mulf %254, %207 : vector<2x32xf32>
    %264 = arith.mulf %248, %256 : vector<2x32xf32>
    %265 = arith.addf %263, %264 : vector<2x32xf32>
    %266 = math.tanh %265 : vector<2x32xf32>
    %267 = arith.mulf %262, %266 : vector<2x32xf32>
    %268 = tpu.concatenate %267, %237 in 1 : vector<2x32xf32>, vector<2x32xf32> -> vector<2x64xf32>
    %cst_51 = arith.constant dense<0.000000e+00> : vector<2x128xf32>
    %269 = tpu.matmul %268, %1, %cst_51 {dimension_numbers = #tpu.dot_dimension_numbers<[1], [0], [0], [1], [0, 0, 1, 1], [], []>} : vector<2x64xf32>, vector<64x128xf32>, vector<2x128xf32> -> vector<2x128xf32>
    %270 = arith.addf %269, %4 : vector<2x128xf32>
    %271 = vector.extract_strided_slice %270 {offsets = [0, 0], sizes = [2, 32], strides = [1, 1]} : vector<2x128xf32> to vector<2x32xf32>
    %272 = arith.negf %271 : vector<2x32xf32>
    %273 = math.exp %272 : vector<2x32xf32>
    %cst_52 = arith.constant 1.000000e+00 : f32
    %274 = vector.broadcast %cst_52 : f32 to vector<2x32xf32>
    %275 = arith.addf %274, %273 : vector<2x32xf32>
    %276 = arith.divf %274, %275 : vector<2x32xf32>
    %277 = vector.extract_strided_slice %270 {offsets = [0, 32], sizes = [2, 32], strides = [1, 1]} : vector<2x128xf32> to vector<2x32xf32>
    %278 = arith.negf %277 : vector<2x32xf32>
    %279 = math.exp %278 : vector<2x32xf32>
    %cst_53 = arith.constant 1.000000e+00 : f32
    %280 = vector.broadcast %cst_53 : f32 to vector<2x32xf32>
    %281 = arith.addf %280, %279 : vector<2x32xf32>
    %282 = arith.divf %280, %281 : vector<2x32xf32>
    %283 = vector.extract_strided_slice %270 {offsets = [0, 64], sizes = [2, 32], strides = [1, 1]} : vector<2x128xf32> to vector<2x32xf32>
    %284 = math.tanh %283 : vector<2x32xf32>
    %285 = vector.extract_strided_slice %270 {offsets = [0, 96], sizes = [2, 32], strides = [1, 1]} : vector<2x128xf32> to vector<2x32xf32>
    %286 = arith.negf %285 : vector<2x32xf32>
    %287 = math.exp %286 : vector<2x32xf32>
    %cst_54 = arith.constant 1.000000e+00 : f32
    %288 = vector.broadcast %cst_54 : f32 to vector<2x32xf32>
    %289 = arith.addf %288, %287 : vector<2x32xf32>
    %290 = arith.divf %288, %289 : vector<2x32xf32>
    %291 = arith.mulf %282, %235 : vector<2x32xf32>
    %292 = arith.mulf %276, %284 : vector<2x32xf32>
    %293 = arith.addf %291, %292 : vector<2x32xf32>
    %294 = math.tanh %293 : vector<2x32xf32>
    %295 = arith.mulf %290, %294 : vector<2x32xf32>
    %c5_i32 = arith.constant 5 : i32
    %296 = arith.index_cast %c5_i32 : i32 to index
    %c0_55 = arith.constant 0 : index
    %c0_56 = arith.constant 0 : index
    %297 = vector.load %arg1[%296, %c0_55, %c0_56] : memref<8x2x128xf32, #tpu.memory_space<vmem>>, vector<1x2x128xf32>
    %298 = vector.shape_cast %297 : vector<1x2x128xf32> to vector<2x128xf32>
    %cst_57 = arith.constant dense<0.000000e+00> : vector<2x128xf32>
    %299 = tpu.matmul %267, %0, %cst_57 {dimension_numbers = #tpu.dot_dimension_numbers<[1], [0], [0], [1], [0, 0, 1, 1], [], []>} : vector<2x32xf32>, vector<32x128xf32>, vector<2x128xf32> -> vector<2x128xf32>
    %300 = arith.addf %298, %299 : vector<2x128xf32>
    %301 = vector.extract_strided_slice %300 {offsets = [0, 0], sizes = [2, 32], strides = [1, 1]} : vector<2x128xf32> to vector<2x32xf32>
    %302 = arith.negf %301 : vector<2x32xf32>
    %303 = math.exp %302 : vector<2x32xf32>
    %cst_58 = arith.constant 1.000000e+00 : f32
    %304 = vector.broadcast %cst_58 : f32 to vector<2x32xf32>
    %305 = arith.addf %304, %303 : vector<2x32xf32>
    %306 = arith.divf %304, %305 : vector<2x32xf32>
    %307 = vector.extract_strided_slice %300 {offsets = [0, 32], sizes = [2, 32], strides = [1, 1]} : vector<2x128xf32> to vector<2x32xf32>
    %308 = arith.negf %307 : vector<2x32xf32>
    %309 = math.exp %308 : vector<2x32xf32>
    %cst_59 = arith.constant 1.000000e+00 : f32
    %310 = vector.broadcast %cst_59 : f32 to vector<2x32xf32>
    %311 = arith.addf %310, %309 : vector<2x32xf32>
    %312 = arith.divf %310, %311 : vector<2x32xf32>
    %313 = vector.extract_strided_slice %300 {offsets = [0, 64], sizes = [2, 32], strides = [1, 1]} : vector<2x128xf32> to vector<2x32xf32>
    %314 = math.tanh %313 : vector<2x32xf32>
    %315 = vector.extract_strided_slice %300 {offsets = [0, 96], sizes = [2, 32], strides = [1, 1]} : vector<2x128xf32> to vector<2x32xf32>
    %316 = arith.negf %315 : vector<2x32xf32>
    %317 = math.exp %316 : vector<2x32xf32>
    %cst_60 = arith.constant 1.000000e+00 : f32
    %318 = vector.broadcast %cst_60 : f32 to vector<2x32xf32>
    %319 = arith.addf %318, %317 : vector<2x32xf32>
    %320 = arith.divf %318, %319 : vector<2x32xf32>
    %321 = arith.mulf %312, %265 : vector<2x32xf32>
    %322 = arith.mulf %306, %314 : vector<2x32xf32>
    %323 = arith.addf %321, %322 : vector<2x32xf32>
    %324 = math.tanh %323 : vector<2x32xf32>
    %325 = arith.mulf %320, %324 : vector<2x32xf32>
    %326 = tpu.concatenate %325, %295 in 1 : vector<2x32xf32>, vector<2x32xf32> -> vector<2x64xf32>
    %cst_61 = arith.constant dense<0.000000e+00> : vector<2x128xf32>
    %327 = tpu.matmul %326, %1, %cst_61 {dimension_numbers = #tpu.dot_dimension_numbers<[1], [0], [0], [1], [0, 0, 1, 1], [], []>} : vector<2x64xf32>, vector<64x128xf32>, vector<2x128xf32> -> vector<2x128xf32>
    %328 = arith.addf %327, %4 : vector<2x128xf32>
    %329 = vector.extract_strided_slice %328 {offsets = [0, 0], sizes = [2, 32], strides = [1, 1]} : vector<2x128xf32> to vector<2x32xf32>
    %330 = arith.negf %329 : vector<2x32xf32>
    %331 = math.exp %330 : vector<2x32xf32>
    %cst_62 = arith.constant 1.000000e+00 : f32
    %332 = vector.broadcast %cst_62 : f32 to vector<2x32xf32>
    %333 = arith.addf %332, %331 : vector<2x32xf32>
    %334 = arith.divf %332, %333 : vector<2x32xf32>
    %335 = vector.extract_strided_slice %328 {offsets = [0, 32], sizes = [2, 32], strides = [1, 1]} : vector<2x128xf32> to vector<2x32xf32>
    %336 = arith.negf %335 : vector<2x32xf32>
    %337 = math.exp %336 : vector<2x32xf32>
    %cst_63 = arith.constant 1.000000e+00 : f32
    %338 = vector.broadcast %cst_63 : f32 to vector<2x32xf32>
    %339 = arith.addf %338, %337 : vector<2x32xf32>
    %340 = arith.divf %338, %339 : vector<2x32xf32>
    %341 = vector.extract_strided_slice %328 {offsets = [0, 64], sizes = [2, 32], strides = [1, 1]} : vector<2x128xf32> to vector<2x32xf32>
    %342 = math.tanh %341 : vector<2x32xf32>
    %343 = vector.extract_strided_slice %328 {offsets = [0, 96], sizes = [2, 32], strides = [1, 1]} : vector<2x128xf32> to vector<2x32xf32>
    %344 = arith.negf %343 : vector<2x32xf32>
    %345 = math.exp %344 : vector<2x32xf32>
    %cst_64 = arith.constant 1.000000e+00 : f32
    %346 = vector.broadcast %cst_64 : f32 to vector<2x32xf32>
    %347 = arith.addf %346, %345 : vector<2x32xf32>
    %348 = arith.divf %346, %347 : vector<2x32xf32>
    %349 = arith.mulf %340, %293 : vector<2x32xf32>
    %350 = arith.mulf %334, %342 : vector<2x32xf32>
    %351 = arith.addf %349, %350 : vector<2x32xf32>
    %352 = math.tanh %351 : vector<2x32xf32>
    %353 = arith.mulf %348, %352 : vector<2x32xf32>
    %c6_i32 = arith.constant 6 : i32
    %354 = arith.index_cast %c6_i32 : i32 to index
    %c0_65 = arith.constant 0 : index
    %c0_66 = arith.constant 0 : index
    %355 = vector.load %arg1[%354, %c0_65, %c0_66] : memref<8x2x128xf32, #tpu.memory_space<vmem>>, vector<1x2x128xf32>
    %356 = vector.shape_cast %355 : vector<1x2x128xf32> to vector<2x128xf32>
    %cst_67 = arith.constant dense<0.000000e+00> : vector<2x128xf32>
    %357 = tpu.matmul %325, %0, %cst_67 {dimension_numbers = #tpu.dot_dimension_numbers<[1], [0], [0], [1], [0, 0, 1, 1], [], []>} : vector<2x32xf32>, vector<32x128xf32>, vector<2x128xf32> -> vector<2x128xf32>
    %358 = arith.addf %356, %357 : vector<2x128xf32>
    %359 = vector.extract_strided_slice %358 {offsets = [0, 0], sizes = [2, 32], strides = [1, 1]} : vector<2x128xf32> to vector<2x32xf32>
    %360 = arith.negf %359 : vector<2x32xf32>
    %361 = math.exp %360 : vector<2x32xf32>
    %cst_68 = arith.constant 1.000000e+00 : f32
    %362 = vector.broadcast %cst_68 : f32 to vector<2x32xf32>
    %363 = arith.addf %362, %361 : vector<2x32xf32>
    %364 = arith.divf %362, %363 : vector<2x32xf32>
    %365 = vector.extract_strided_slice %358 {offsets = [0, 32], sizes = [2, 32], strides = [1, 1]} : vector<2x128xf32> to vector<2x32xf32>
    %366 = arith.negf %365 : vector<2x32xf32>
    %367 = math.exp %366 : vector<2x32xf32>
    %cst_69 = arith.constant 1.000000e+00 : f32
    %368 = vector.broadcast %cst_69 : f32 to vector<2x32xf32>
    %369 = arith.addf %368, %367 : vector<2x32xf32>
    %370 = arith.divf %368, %369 : vector<2x32xf32>
    %371 = vector.extract_strided_slice %358 {offsets = [0, 64], sizes = [2, 32], strides = [1, 1]} : vector<2x128xf32> to vector<2x32xf32>
    %372 = math.tanh %371 : vector<2x32xf32>
    %373 = vector.extract_strided_slice %358 {offsets = [0, 96], sizes = [2, 32], strides = [1, 1]} : vector<2x128xf32> to vector<2x32xf32>
    %374 = arith.negf %373 : vector<2x32xf32>
    %375 = math.exp %374 : vector<2x32xf32>
    %cst_70 = arith.constant 1.000000e+00 : f32
    %376 = vector.broadcast %cst_70 : f32 to vector<2x32xf32>
    %377 = arith.addf %376, %375 : vector<2x32xf32>
    %378 = arith.divf %376, %377 : vector<2x32xf32>
    %379 = arith.mulf %370, %323 : vector<2x32xf32>
    %380 = arith.mulf %364, %372 : vector<2x32xf32>
    %381 = arith.addf %379, %380 : vector<2x32xf32>
    %382 = math.tanh %381 : vector<2x32xf32>
    %383 = arith.mulf %378, %382 : vector<2x32xf32>
    %384 = tpu.concatenate %383, %353 in 1 : vector<2x32xf32>, vector<2x32xf32> -> vector<2x64xf32>
    %cst_71 = arith.constant dense<0.000000e+00> : vector<2x128xf32>
    %385 = tpu.matmul %384, %1, %cst_71 {dimension_numbers = #tpu.dot_dimension_numbers<[1], [0], [0], [1], [0, 0, 1, 1], [], []>} : vector<2x64xf32>, vector<64x128xf32>, vector<2x128xf32> -> vector<2x128xf32>
    %386 = arith.addf %385, %4 : vector<2x128xf32>
    %387 = vector.extract_strided_slice %386 {offsets = [0, 0], sizes = [2, 32], strides = [1, 1]} : vector<2x128xf32> to vector<2x32xf32>
    %388 = arith.negf %387 : vector<2x32xf32>
    %389 = math.exp %388 : vector<2x32xf32>
    %cst_72 = arith.constant 1.000000e+00 : f32
    %390 = vector.broadcast %cst_72 : f32 to vector<2x32xf32>
    %391 = arith.addf %390, %389 : vector<2x32xf32>
    %392 = arith.divf %390, %391 : vector<2x32xf32>
    %393 = vector.extract_strided_slice %386 {offsets = [0, 32], sizes = [2, 32], strides = [1, 1]} : vector<2x128xf32> to vector<2x32xf32>
    %394 = arith.negf %393 : vector<2x32xf32>
    %395 = math.exp %394 : vector<2x32xf32>
    %cst_73 = arith.constant 1.000000e+00 : f32
    %396 = vector.broadcast %cst_73 : f32 to vector<2x32xf32>
    %397 = arith.addf %396, %395 : vector<2x32xf32>
    %398 = arith.divf %396, %397 : vector<2x32xf32>
    %399 = vector.extract_strided_slice %386 {offsets = [0, 64], sizes = [2, 32], strides = [1, 1]} : vector<2x128xf32> to vector<2x32xf32>
    %400 = math.tanh %399 : vector<2x32xf32>
    %401 = vector.extract_strided_slice %386 {offsets = [0, 96], sizes = [2, 32], strides = [1, 1]} : vector<2x128xf32> to vector<2x32xf32>
    %402 = arith.negf %401 : vector<2x32xf32>
    %403 = math.exp %402 : vector<2x32xf32>
    %cst_74 = arith.constant 1.000000e+00 : f32
    %404 = vector.broadcast %cst_74 : f32 to vector<2x32xf32>
    %405 = arith.addf %404, %403 : vector<2x32xf32>
    %406 = arith.divf %404, %405 : vector<2x32xf32>
    %407 = arith.mulf %398, %351 : vector<2x32xf32>
    %408 = arith.mulf %392, %400 : vector<2x32xf32>
    %409 = arith.addf %407, %408 : vector<2x32xf32>
    %410 = math.tanh %409 : vector<2x32xf32>
    %411 = arith.mulf %406, %410 : vector<2x32xf32>
    %c7_i32 = arith.constant 7 : i32
    %412 = arith.index_cast %c7_i32 : i32 to index
    %c0_75 = arith.constant 0 : index
    %c0_76 = arith.constant 0 : index
    %413 = vector.load %arg1[%412, %c0_75, %c0_76] : memref<8x2x128xf32, #tpu.memory_space<vmem>>, vector<1x2x128xf32>
    %414 = vector.shape_cast %413 : vector<1x2x128xf32> to vector<2x128xf32>
    %cst_77 = arith.constant dense<0.000000e+00> : vector<2x128xf32>
    %415 = tpu.matmul %383, %0, %cst_77 {dimension_numbers = #tpu.dot_dimension_numbers<[1], [0], [0], [1], [0, 0, 1, 1], [], []>} : vector<2x32xf32>, vector<32x128xf32>, vector<2x128xf32> -> vector<2x128xf32>
    %416 = arith.addf %414, %415 : vector<2x128xf32>
    %417 = vector.extract_strided_slice %416 {offsets = [0, 0], sizes = [2, 32], strides = [1, 1]} : vector<2x128xf32> to vector<2x32xf32>
    %418 = arith.negf %417 : vector<2x32xf32>
    %419 = math.exp %418 : vector<2x32xf32>
    %cst_78 = arith.constant 1.000000e+00 : f32
    %420 = vector.broadcast %cst_78 : f32 to vector<2x32xf32>
    %421 = arith.addf %420, %419 : vector<2x32xf32>
    %422 = arith.divf %420, %421 : vector<2x32xf32>
    %423 = vector.extract_strided_slice %416 {offsets = [0, 32], sizes = [2, 32], strides = [1, 1]} : vector<2x128xf32> to vector<2x32xf32>
    %424 = arith.negf %423 : vector<2x32xf32>
    %425 = math.exp %424 : vector<2x32xf32>
    %cst_79 = arith.constant 1.000000e+00 : f32
    %426 = vector.broadcast %cst_79 : f32 to vector<2x32xf32>
    %427 = arith.addf %426, %425 : vector<2x32xf32>
    %428 = arith.divf %426, %427 : vector<2x32xf32>
    %429 = vector.extract_strided_slice %416 {offsets = [0, 64], sizes = [2, 32], strides = [1, 1]} : vector<2x128xf32> to vector<2x32xf32>
    %430 = math.tanh %429 : vector<2x32xf32>
    %431 = vector.extract_strided_slice %416 {offsets = [0, 96], sizes = [2, 32], strides = [1, 1]} : vector<2x128xf32> to vector<2x32xf32>
    %432 = arith.negf %431 : vector<2x32xf32>
    %433 = math.exp %432 : vector<2x32xf32>
    %cst_80 = arith.constant 1.000000e+00 : f32
    %434 = vector.broadcast %cst_80 : f32 to vector<2x32xf32>
    %435 = arith.addf %434, %433 : vector<2x32xf32>
    %436 = arith.divf %434, %435 : vector<2x32xf32>
    %437 = arith.mulf %428, %381 : vector<2x32xf32>
    %438 = arith.mulf %422, %430 : vector<2x32xf32>
    %439 = arith.addf %437, %438 : vector<2x32xf32>
    %440 = math.tanh %439 : vector<2x32xf32>
    %441 = arith.mulf %436, %440 : vector<2x32xf32>
    %442 = tpu.concatenate %441, %411 in 1 : vector<2x32xf32>, vector<2x32xf32> -> vector<2x64xf32>
    %cst_81 = arith.constant dense<0.000000e+00> : vector<2x128xf32>
    %443 = tpu.matmul %442, %1, %cst_81 {dimension_numbers = #tpu.dot_dimension_numbers<[1], [0], [0], [1], [0, 0, 1, 1], [], []>} : vector<2x64xf32>, vector<64x128xf32>, vector<2x128xf32> -> vector<2x128xf32>
    %444 = arith.addf %443, %4 : vector<2x128xf32>
    %445 = vector.extract_strided_slice %444 {offsets = [0, 0], sizes = [2, 32], strides = [1, 1]} : vector<2x128xf32> to vector<2x32xf32>
    %446 = arith.negf %445 : vector<2x32xf32>
    %447 = math.exp %446 : vector<2x32xf32>
    %cst_82 = arith.constant 1.000000e+00 : f32
    %448 = vector.broadcast %cst_82 : f32 to vector<2x32xf32>
    %449 = arith.addf %448, %447 : vector<2x32xf32>
    %450 = arith.divf %448, %449 : vector<2x32xf32>
    %451 = vector.extract_strided_slice %444 {offsets = [0, 32], sizes = [2, 32], strides = [1, 1]} : vector<2x128xf32> to vector<2x32xf32>
    %452 = arith.negf %451 : vector<2x32xf32>
    %453 = math.exp %452 : vector<2x32xf32>
    %cst_83 = arith.constant 1.000000e+00 : f32
    %454 = vector.broadcast %cst_83 : f32 to vector<2x32xf32>
    %455 = arith.addf %454, %453 : vector<2x32xf32>
    %456 = arith.divf %454, %455 : vector<2x32xf32>
    %457 = vector.extract_strided_slice %444 {offsets = [0, 64], sizes = [2, 32], strides = [1, 1]} : vector<2x128xf32> to vector<2x32xf32>
    %458 = math.tanh %457 : vector<2x32xf32>
    %459 = vector.extract_strided_slice %444 {offsets = [0, 96], sizes = [2, 32], strides = [1, 1]} : vector<2x128xf32> to vector<2x32xf32>
    %460 = arith.negf %459 : vector<2x32xf32>
    %461 = math.exp %460 : vector<2x32xf32>
    %cst_84 = arith.constant 1.000000e+00 : f32
    %462 = vector.broadcast %cst_84 : f32 to vector<2x32xf32>
    %463 = arith.addf %462, %461 : vector<2x32xf32>
    %464 = arith.divf %462, %463 : vector<2x32xf32>
    %465 = arith.mulf %456, %409 : vector<2x32xf32>
    %466 = arith.mulf %450, %458 : vector<2x32xf32>
    %467 = arith.addf %465, %466 : vector<2x32xf32>
    %468 = math.tanh %467 : vector<2x32xf32>
    %469 = arith.mulf %464, %468 : vector<2x32xf32>
    %c8_i32 = arith.constant 8 : i32
    %c0_85 = arith.constant 0 : index
    %c0_86 = arith.constant 0 : index
    %470 = vector.load %arg5[%c0_85, %c0_86] : memref<32x5xf32, #tpu.memory_space<vmem>>, vector<32x5xf32>
    %cst_87 = arith.constant dense<0.000000e+00> : vector<2x5xf32>
    %471 = tpu.matmul %469, %470, %cst_87 {dimension_numbers = #tpu.dot_dimension_numbers<[1], [0], [0], [1], [0, 0, 1, 1], [], []>} : vector<2x32xf32>, vector<32x5xf32>, vector<2x5xf32> -> vector<2x5xf32>
    %c0_88 = arith.constant 0 : index
    %c0_89 = arith.constant 0 : index
    %472 = vector.load %arg6[%c0_88, %c0_89] : memref<1x5xf32, #tpu.memory_space<vmem>>, vector<1x5xf32>
    %473 = vector.broadcast %472 : vector<1x5xf32> to vector<2x5xf32>
    %474 = arith.addf %471, %473 : vector<2x5xf32>
    %c0_90 = arith.constant 0 : index
    %c0_91 = arith.constant 0 : index
    %475 = vector.load %arg7[%c0_90, %c0_91] : memref<2x5xf32, #tpu.memory_space<vmem>>, vector<2x5xf32>
    tpu.vector_store %arg7[%c0_90, %c0_91], %474 {strides = array<i32>} : memref<2x5xf32, #tpu.memory_space<vmem>>, vector<2x5xf32>,
    return
  }
  func.func @transform_0(%arg0: i32) -> (i32, i32, i32) {
    %c0_i32 = arith.constant 0 : i32
    %c0_i32_0 = arith.constant 0 : i32
    %c0_i32_1 = arith.constant 0 : i32
    %c0_i32_2 = arith.constant 0 : i32
    return %c0_i32, %c0_i32_0, %c0_i32_1 : i32, i32, i32
  }
  func.func @transform_1(%arg0: i32) -> (i32, i32) {
    %c0_i32 = arith.constant 0 : i32
    %c0_i32_0 = arith.constant 0 : i32
    %c0_i32_1 = arith.constant 0 : i32
    return %c0_i32, %c0_i32_0 : i32, i32
  }
  func.func @transform_2(%arg0: i32) -> (i32, i32) {
    %c0_i32 = arith.constant 0 : i32
    %c0_i32_0 = arith.constant 0 : i32
    %c0_i32_1 = arith.constant 0 : i32
    return %c0_i32, %c0_i32_0 : i32, i32
  }
  func.func @transform_3(%arg0: i32) -> (i32, i32) {
    %c0_i32 = arith.constant 0 : i32
    %c0_i32_0 = arith.constant 0 : i32
    %c0_i32_1 = arith.constant 0 : i32
    return %c0_i32, %c0_i32_0 : i32, i32
  }
  func.func @transform_4(%arg0: i32) -> (i32, i32) {
    %c0_i32 = arith.constant 0 : i32
    %c0_i32_0 = arith.constant 0 : i32
    %c0_i32_1 = arith.constant 0 : i32
    return %c0_i32, %c0_i32_0 : i32, i32
  }
  func.func @transform_5(%arg0: i32) -> (i32, i32) {
    %c0_i32 = arith.constant 0 : i32
    %c0_i32_0 = arith.constant 0 : i32
    %c0_i32_1 = arith.constant 0 : i32
    return %c0_i32, %c0_i32_0 : i32, i32
  }
  func.func @transform_6(%arg0: i32) -> (i32, i32) {
    %c0_i32 = arith.constant 0 : i32
    %c0_i32_0 = arith.constant 0 : i32
    %c0_i32_1 = arith.constant 0 : i32
    return %c0_i32, %c0_i32_0 : i32, i32
  }
}

</mosaic_0001>

<bundles_post_ra>
// kernel: tpu_custom_call.1
= control target key start
LH: loop header
LB: loop body
LE: loop exit
PB: predicated region body
PF: predicated region fallthrough
CT: control target
= control target key end

     0   :  { %11 = vsyncpa [#allocation3], 0  ;;  %s2913_s0 = inlined_call_operand.hbm [shape: f32[8,2,128], index: 0, kind: input, shape index: {}]   ;;  %s2914_s1 = inlined_call_operand.vmem [shape: f32[32,128], index: 1, kind: input, shape index: {}]   ;;  %s2915_s2 = inlined_call_operand.hbm [shape: f32[64,128], index: 2, kind: input, shape index: {}]   ;;  %s2916_s3 = inlined_call_operand.vmem [shape: f32[1,128], index: 3, kind: input, shape index: {}]   ;;  %s2917_s4 = inlined_call_operand.vmem [shape: f32[32,5], index: 4, kind: input, shape index: {}]   ;;  %s2918_s5 = inlined_call_operand.vmem [shape: f32[1,5], index: 5, kind: input, shape index: {}]   ;;  %s2919_s6 = inlined_call_operand.hbm [shape: f32[2,5], index: 6, kind: output, shape index: {}]  }
   0x1   :  { %12 = vsyncpa [#allocation6], 0 }
   0x2   :  { %13 = vsyncpa [#allocation4], 0  ;;  %s2427_s21 = smov [#allocation2]  }
   0x3   :  { %s19_s22 = sshll.u32 %s2427_s21, 4  ;;  %s20_s22 = int_to_ptr.vmem [resolvable:$true] %s19_s22 }
   0x4   :  { %s2369_s23 = scalar_lea.vmem %s20_s22, 256  ;;  %p2374_p1 = scmp.lt.s32.totalorder %s20_s22, %s20_s22 }
   0x5   :  { %p2370_p0 = scmp.ne.s32.totalorder %s20_s22, %s2369_s23  ;;  %p2375_p2 = scmp.lt.s32.totalorder %s2369_s23, %s2369_s23 }
   0x7   :  { %p2376_p3 = por %p2375_p2, %p2374_p1 }
   0x9   :  { %p2377_p4 = pnand %p2376_p3, %p2370_p0 }
   0xb   :  { %2380 = shalt.err (!%p2377_p4)
}
   0xc   :  { %s2428_s24 = smov 32   ;;  %s2429_s25 = smov 2  }
   0xd   :  { %25 = dma.hbm_to_vmem [thread:$0]  %s2913_s0, 256, %s20_s22, [#allocation3], %s2428_s24, %s2428_s24, %s2429_s25  }
   0xe   :  { %s2430_s28 = smov [#allocation5]  }
   0xf   :  { %s33_s29 = sshll.u32 %s2430_s28, 4  ;;  %s34_s29 = int_to_ptr.vmem [resolvable:$true] %s33_s29 }
  0x10   :  { %s2389_s30 = scalar_lea.vmem %s34_s29, 1024  ;;  %p2394_p6 = scmp.lt.s32.totalorder %s34_s29, %s34_s29 }
  0x11   :  { %p2390_p5 = scmp.ne.s32.totalorder %s34_s29, %s2389_s30  ;;  %p2395_p7 = scmp.lt.s32.totalorder %s2389_s30, %s2389_s30 }
  0x13   :  { %p2396_p8 = por %p2395_p7, %p2394_p6 }
  0x15   :  { %p2397_p9 = pnand %p2396_p8, %p2390_p5 }
  0x17   :  { %2400 = shalt.err (!%p2397_p9)
}
  0x18   :  { %s2431_s7 = smov 128   ;;  %s2432_s8 = smov 8  }
  0x19   :  { %39 = dma.hbm_to_vmem [thread:$0]  %s2915_s2, 1024, %s34_s29, [#allocation6], %s2431_s7, %s2431_s7, %s2432_s8  }
  0x1a   :  { %2421 = dma.done.wait [#allocation3], 256  }
  0x1b   :  { %2422 = vsyncadd [#allocation3], 4294967040 }
  0x1c   :  { %2423 = dma.done.wait [#allocation6], 1024  }
  0x1d   :  { %2424 = vsyncadd [#allocation6], 4294966272  ;;  %v2433_v0 = vmov 0.0   ;;  %vm2434_vm0 = vmmov 0   ;;  %v2489_v1 = vld [vmem:[%s2914_s1 + $0x18] sm:$0xff]  ;;  %v2494_v2 = vld [vmem:[%s2914_s1 + $0x10] sm:$0xff] }
  0x1e   :  { %1964 = vmatprep.subr.mxu0 %v2433_v0  ;;  %1972 = vmatprep.mubr.msk.f32.mxu0 %vm2434_vm0, %v2433_v0  ;;  %v2501_v3 = vld [vmem:[%s2914_s1 + $0x8] sm:$0xff]  ;;  %v2508_v4 = vld [vmem:[%s2914_s1] sm:$0xff]  ;;  %s2435_s1 = smov 64   ;;  %v2536_v21 = vld [vmem:[#allocation5 + $0x28] sm:$0xff]  ;;  %vm72_vm1 = vcmask 261120   ;;  %vm176_vm2 = vcmask 523264  }
  0x1f   :  { %1975 = vmatprep.subr.mxu1 %v2433_v0  ;;  %1991 = vmatprep.mubr.msk.f32.mxu1 %vm2434_vm0, %v2433_v0  ;;  %v71_v5 = vld [vmem:[#allocation2] sm:$0x3]  ;;  %v2530_v19 = vld [vmem:[#allocation5 + $0x38] sm:$0xff]  ;;  %v2540_v22 = vld [vmem:[#allocation5 + $0x20] sm:$0xff]  ;;  %s2436_s7 = smov [#allocation7]   ;;  %vm1795_vm3 = vcmask 33792  }
  0x20   :  { %1965 = vmatpush3.msra.mxu0 %v2489_v1  ;;  %v2532_v20 = vld [vmem:[#allocation5 + $0x30] sm:$0xff]  ;;  %1976 = vmatpush3.msra.mxu1 %v2530_v19  ;;  %v2544_v23 = vld [vmem:[#allocation5 + $0x18] sm:$0xff]  ;;  %v2552_v26 = vld [vmem:[#allocation5 + $0x8] sm:$0xff] }
  0x21   :  { %1966 = vmatprep.subr.mxu0 %v2433_v0  ;;  %1977 = vmatprep.subr.mxu1 %v2433_v0  ;;  %v2548_v24 = vld [vmem:[#allocation5 + $0x10] sm:$0xff]  ;;  %v2559_v27 = vld [vmem:[#allocation5] sm:$0xff] }
  0x22   :  { %1967 = vmatpush3.msra.mxu0 %v2494_v2  ;;  %1978 = vmatpush3.msra.mxu1 %v2532_v20  ;;  %v275_v32 = vld [vmem:[#allocation2 + $0x2] sm:$0x3]  ;;  %v2598_v33 = vld [vmem:[%s2916_s3] ss:$0 sm:$0xff] }
  0x23   :  { %1968 = vmatprep.subr.mxu0 %v2433_v0  ;;  %1979 = vmatprep.subr.mxu1 %v2433_v0 }
  0x24   :  { %1969 = vmatpush3.msra.mxu0 %v2501_v3  ;;  %1980 = vmatpush3.msra.mxu1 %v2536_v21 }
  0x25   :  { %1970 = vmatprep.subr.mxu0 %v2433_v0  ;;  %1981 = vmatprep.subr.mxu1 %v2433_v0 }
  0x26   :  { %1971 = vmatpush3.msra.mxu0 %v2508_v4  ;;  %1982 = vmatpush3.msra.mxu1 %v2540_v22 }
  0x27   :  { %1973 = vmatmul.mubr.f32.vlgmr.msra.gmra.mxu0 %v2433_v0  ;;  %1994 = vmatprep.subr.mxu0 %v2433_v0 }
  0x28   :  { %1995 = vmatpush3.msra.mxu0 %v2489_v1  ;;  %2002 = vmatprep.mubr.msk.f32.mxu0 %vm2434_vm0, %v2433_v0 }
  0x29   :  { %1996 = vmatprep.subr.mxu0 %v2433_v0  ;;  %1983 = vmatprep.subr.mxu1 %v2433_v0 }
  0x2a   :  { %1997 = vmatpush3.msra.mxu0 %v2494_v2  ;;  %1984 = vmatpush3.msra.mxu1 %v2544_v23 }
  0x2b   :  { %1998 = vmatprep.subr.mxu0 %v2433_v0  ;;  %1985 = vmatprep.subr.mxu1 %v2433_v0 }
  0x2c   :  { %1999 = vmatpush3.msra.mxu0 %v2501_v3  ;;  %1986 = vmatpush3.msra.mxu1 %v2548_v24 }
  0x2d   :  { %2000 = vmatprep.subr.mxu0 %v2433_v0  ;;  %1987 = vmatprep.subr.mxu1 %v2433_v0 }
  0x2e   :  { %2001 = vmatpush3.msra.mxu0 %v2508_v4  ;;  %1988 = vmatpush3.msra.mxu1 %v2552_v26 }
  0x2f   :  { %2005 = vmatprep.subr.mxu0 %v2433_v0  ;;  %1989 = vmatprep.subr.mxu1 %v2433_v0 }
  0x30   :  { %1990 = vmatpush3.msra.mxu1 %v2559_v27 }
  0x31   :  { %2024 = vmatprep.subr.mxu1 %v2433_v0 }
  0xe7   :  { %v142_v6 = vpop.f32.mrf.mxu0 }
  0xe8   :  { %v146_v7 = vadd.f32 %v142_v6, %v71_v5 }
  0xe9   :  { %v1974_v8 = vpop.f32.mrf.mxu0 }
  0xea   :  { %2225 = vtanh.f32 %v146_v7  ;;  %v1814_v10 = vmul.f32 -1.442695, %v146_v7 }
  0xec   :  { %2227 = vpow2.f32 %v1814_v10  ;;  %v480_v10 = vld [vmem:[#allocation2 + $0x4] sm:$0x3] }
  0xf7   :  { %v2226_v9 = vpop.eup %2225 }
  0xf8   :  { %156 = vrot.lane.b32.xlu0 %v2226_v9, %s2435_s1 }
  0xf9   :  { %v2228_v11 = vpop.eup %2227 }
  0xfa   :  { %v150_v12 = vadd.f32 1.0, %v2228_v11 }
  0xfc   :  { %2229 = vrcp.f32 %v150_v12 }
 0x109   :  { %v2230_v13 = vpop.eup %2229 }
 0x10a   :  { %v154_v16 = vmul.f32 0.0, %v2230_v13 }
 0x16a   :  { %v157_v14 = vpop.permute.xlu0 %156 }
 0x16b   :  { %v159_v15 = vmul.f32 %v2230_v13, %v157_v14 }
 0x16d   :  { %161 = vrot.lane.b32.xlu0 %v159_v15, %s2428_s24 }
 0x1df   :  { %v162_v17 = vpop.permute.xlu0 %161 }
 0x1e0   :  { %v2527_v18 = vadd.f32 %v162_v17, %v154_v16 }
 0x1e2   :  { %2231 = vtanh.f32 %v2527_v18 }
 0x1ef   :  { %v2232_v25 = vpop.eup %2231 }
 0x1f0   :  { %167 = vrot.lane.b32.xlu1 %v2232_v25, %s2435_s1 }
 0x262   :  { %v168_v28 = vpop.permute.xlu1 %167 }
 0x263   :  { %v170_v29 = vmul.f32 %v2230_v13, %v168_v28 }
 0x265   :  { %172 = vrot.lane.b32.xlu1 %v170_v29, %s2428_s24 }
 0x2d7   :  { %v173_v30 = vpop.permute.xlu1 %172 }
 0x2d8   :  { %v175_v31 = vsel %vm72_vm1, %v173_v30, 0.0  ;;  %2003 = vmatmul.mubr.msk.f32.vlgmr.msra.gmra.mxu0 %vm72_vm1, %v173_v30 }
 0x2d9   :  { %1992 = vmatmul.mubr.msk.f32.vlgmr.msra.gmra.mxu1 %vm176_vm2, %v175_v31  ;;  %2006 = vmatpush3.msra.mxu0 %v2530_v19 }
 0x2da   :  { %2007 = vmatprep.subr.mxu0 %v2433_v0  ;;  %2025 = vmatpush3.msra.mxu1 %v2489_v1 }
 0x2db   :  { %2008 = vmatpush3.msra.mxu0 %v2532_v20  ;;  %2026 = vmatprep.subr.mxu1 %v2433_v0 }
 0x2dc   :  { %2009 = vmatprep.subr.mxu0 %v2433_v0  ;;  %2027 = vmatpush3.msra.mxu1 %v2494_v2 }
 0x2dd   :  { %2010 = vmatpush3.msra.mxu0 %v2536_v21  ;;  %2028 = vmatprep.subr.mxu1 %v2433_v0 }
 0x2de   :  { %2011 = vmatprep.subr.mxu0 %v2433_v0  ;;  %2029 = vmatpush3.msra.mxu1 %v2501_v3 }
 0x2df   :  { %2012 = vmatpush3.msra.mxu0 %v2540_v22  ;;  %2030 = vmatprep.subr.mxu1 %v2433_v0 }
 0x2e0   :  { %2013 = vmatprep.subr.mxu0 %v2433_v0  ;;  %2031 = vmatpush3.msra.mxu1 %v2508_v4 }
 0x2e1   :  { %2014 = vmatpush3.msra.mxu0 %v2544_v23  ;;  %2032 = vmatprep.mubr.msk.f32.mxu1 %vm2434_vm0, %v2433_v0 }
 0x2e2   :  { %2015 = vmatprep.subr.mxu0 %v2433_v0  ;;  %2021 = vmatprep.mubr.msk.f32.mxu0 %vm2434_vm0, %v2433_v0 }
 0x2e3   :  { %2016 = vmatpush3.msra.mxu0 %v2548_v24  ;;  %2035 = vmatprep.subr.mxu1 %v2433_v0 }
 0x2e4   :  { %2017 = vmatprep.subr.mxu0 %v2433_v0 }
 0x2e5   :  { %2018 = vmatpush3.msra.mxu0 %v2552_v26 }
 0x2e6   :  { %2019 = vmatprep.subr.mxu0 %v2433_v0 }
 0x2e7   :  { %2020 = vmatpush3.msra.mxu0 %v2559_v27 }
 0x2e8   :  { %2054 = vmatprep.subr.mxu0 %v2433_v0 }
 0x398   :  { %v344_v34 = vpop.f32.mrf.mxu0 }
 0x399   :  { %v348_v35 = vadd.f32 %v344_v34, %v275_v32  ;;  %v246_v36 = vpop.f32.mrf.mxu1 }
 0x39a   :  { %v247_v37 = vadd.f32 %v2598_v33, %v246_v36  ;;  %v2004_v38 = vpop.f32.mrf.mxu0 }
 0x39b   :  { %2233 = vtanh.f32 %v348_v35  ;;  %v1993_v39 = vpop.f32.mrf.mxu1  ;;  %v1818_v42 = vmul.f32 -1.442695, %v348_v35 }
 0x39c   :  { %2235 = vtanh.f32 %v247_v37  ;;  %v1816_v43 = vmul.f32 -1.442695, %v247_v37 }
 0x39d   :  { %2237 = vpow2.f32 %v1818_v42 }
 0x39e   :  { %2239 = vpow2.f32 %v1816_v43 }
 0x3a8   :  { %v2234_v40 = vpop.eup %2233 }
 0x3a9   :  { %v2236_v41 = vpop.eup %2235  ;;  %358 = vrot.lane.b32.xlu1 %v2234_v40, %s2435_s1 }
 0x3aa   :  { %259 = vrot.lane.b32.xlu0 %v2236_v41, %s2435_s1  ;;  %v2238_v44 = vpop.eup %2237 }
 0x3ab   :  { %v2240_v45 = vpop.eup %2239  ;;  %v352_v46 = vadd.f32 1.0, %v2238_v44 }
 0x3ac   :  { %v253_v47 = vadd.f32 1.0, %v2240_v45 }
 0x3ad   :  { %2241 = vrcp.f32 %v352_v46 }
 0x3ae   :  { %2243 = vrcp.f32 %v253_v47 }
 0x3ba   :  { %v2242_v48 = vpop.eup %2241 }
 0x3bb   :  { %v2244_v50 = vpop.eup %2243  ;;  %v356_v54 = vmul.f32 %v2242_v48, %v2527_v18 }
 0x3bc   :  { %v257_v56 = vmul.f32 0.0, %v2244_v50 }
 0x41b   :  { %v359_v49 = vpop.permute.xlu1 %358 }
 0x41c   :  { %v361_v51 = vmul.f32 %v2242_v48, %v359_v49  ;;  %v260_v52 = vpop.permute.xlu0 %259 }
 0x41d   :  { %v262_v53 = vmul.f32 %v2244_v50, %v260_v52 }
 0x41e   :  { %363 = vrot.lane.b32.xlu1 %v361_v51, %s2428_s24 }
 0x41f   :  { %264 = vrot.lane.b32.xlu0 %v262_v53, %s2428_s24 }
 0x490   :  { %v364_v55 = vpop.permute.xlu1 %363 }
 0x491   :  { %v2606_v57 = vadd.f32 %v364_v55, %v356_v54  ;;  %v265_v58 = vpop.permute.xlu0 %264  ;;  %v685_v55 = vld [vmem:[#allocation2 + $0x6] sm:$0x3] }
 0x492   :  { %v2608_v59 = vadd.f32 %v265_v58, %v257_v56 }
 0x493   :  { %2245 = vtanh.f32 %v2606_v57 }
 0x494   :  { %2247 = vtanh.f32 %v2608_v59 }
 0x4a0   :  { %v2246_v60 = vpop.eup %2245 }
 0x4a1   :  { %v2248_v61 = vpop.eup %2247  ;;  %369 = vrot.lane.b32.xlu1 %v2246_v60, %s2435_s1 }
 0x4a2   :  { %270 = vrot.lane.b32.xlu0 %v2248_v61, %s2435_s1 }
 0x513   :  { %v370_v62 = vpop.permute.xlu1 %369 }
 0x514   :  { %v372_v63 = vmul.f32 %v2242_v48, %v370_v62  ;;  %v271_v5 = vpop.permute.xlu0 %270 }
 0x515   :  { %v273_v6 = vmul.f32 %v2244_v50, %v271_v5 }
 0x516   :  { %374 = vrot.lane.b32.xlu0 %v372_v63, %s2428_s24 }
 0x517   :  { %378 = vrot.lane.b32.xlu1 %v273_v6, %s2435_s1 }
 0x588   :  { %v375_v7 = vpop.permute.xlu0 %374 }
 0x589   :  { %2033 = vmatmul.mubr.msk.f32.vlgmr.msra.gmra.mxu1 %vm72_vm1, %v375_v7  ;;  %v379_v8 = vpop.permute.xlu1 %378 }
 0x58a   :  { %v381_v9 = vsel %vm72_vm1, %v375_v7, %v379_v8  ;;  %2036 = vmatpush3.msra.mxu1 %v2530_v19  ;;  %2051 = vmatprep.mubr.msk.f32.mxu1 %vm2434_vm0, %v2433_v0 }
 0x58b   :  { %2022 = vmatmul.mubr.msk.f32.vlgmr.msra.gmra.mxu0 %vm176_vm2, %v381_v9  ;;  %2037 = vmatprep.subr.mxu1 %v2433_v0 }
 0x58c   :  { %2038 = vmatpush3.msra.mxu1 %v2532_v20  ;;  %2055 = vmatpush3.msra.mxu0 %v2489_v1 }
 0x58d   :  { %2039 = vmatprep.subr.mxu1 %v2433_v0  ;;  %2056 = vmatprep.subr.mxu0 %v2433_v0 }
 0x58e   :  { %2040 = vmatpush3.msra.mxu1 %v2536_v21  ;;  %2057 = vmatpush3.msra.mxu0 %v2494_v2 }
 0x58f   :  { %2041 = vmatprep.subr.mxu1 %v2433_v0  ;;  %2058 = vmatprep.subr.mxu0 %v2433_v0 }
 0x590   :  { %2042 = vmatpush3.msra.mxu1 %v2540_v22  ;;  %2059 = vmatpush3.msra.mxu0 %v2501_v3 }
 0x591   :  { %2043 = vmatprep.subr.mxu1 %v2433_v0  ;;  %2060 = vmatprep.subr.mxu0 %v2433_v0 }
 0x592   :  { %2044 = vmatpush3.msra.mxu1 %v2544_v23  ;;  %2061 = vmatpush3.msra.mxu0 %v2508_v4 }
 0x593   :  { %2045 = vmatprep.subr.mxu1 %v2433_v0  ;;  %2062 = vmatprep.mubr.msk.f32.mxu0 %vm2434_vm0, %v2433_v0 }
 0x594   :  { %2046 = vmatpush3.msra.mxu1 %v2548_v24  ;;  %2065 = vmatprep.subr.mxu0 %v2433_v0 }
 0x595   :  { %2047 = vmatprep.subr.mxu1 %v2433_v0 }
 0x596   :  { %2048 = vmatpush3.msra.mxu1 %v2552_v26 }
 0x597   :  { %2049 = vmatprep.subr.mxu1 %v2433_v0 }
 0x598   :  { %2050 = vmatpush3.msra.mxu1 %v2559_v27 }
 0x599   :  { %2084 = vmatprep.subr.mxu1 %v2433_v0 }
 0x649   :  { %v549_v11 = vpop.f32.mrf.mxu1 }
 0x64a   :  { %v553_v12 = vadd.f32 %v549_v11, %v480_v10 }
 0x64b   :  { %v451_v13 = vpop.f32.mrf.mxu0  ;;  %v2034_v14 = vpop.f32.mrf.mxu1 }
 0x64c   :  { %2249 = vtanh.f32 %v553_v12  ;;  %v452_v15 = vadd.f32 %v2598_v33, %v451_v13  ;;  %v1822_v25 = vmul.f32 -1.442695, %v553_v12 }
 0x64d   :  { %v2023_v16 = vpop.f32.mrf.mxu0 }
 0x64e   :  { %2251 = vtanh.f32 %v452_v15  ;;  %v1820_v28 = vmul.f32 -1.442695, %v452_v15 }
 0x64f   :  { %2253 = vpow2.f32 %v1822_v25 }
 0x650   :  { %2255 = vpow2.f32 %v1820_v28 }
 0x659   :  { %v2250_v17 = vpop.eup %2249 }
 0x65a   :  { %563 = vrot.lane.b32.xlu1 %v2250_v17, %s2435_s1 }
 0x65b   :  { %v2252_v18 = vpop.eup %2251 }
 0x65c   :  { %464 = vrot.lane.b32.xlu0 %v2252_v18, %s2435_s1  ;;  %v2254_v29 = vpop.eup %2253 }
 0x65d   :  { %v2256_v30 = vpop.eup %2255  ;;  %v557_v31 = vadd.f32 1.0, %v2254_v29 }
 0x65e   :  { %v458_v32 = vadd.f32 1.0, %v2256_v30 }
 0x65f   :  { %2257 = vrcp.f32 %v557_v31 }
 0x660   :  { %2259 = vrcp.f32 %v458_v32 }
 0x66c   :  { %v2258_v34 = vpop.eup %2257 }
 0x66d   :  { %v2260_v37 = vpop.eup %2259  ;;  %v561_v40 = vmul.f32 %v2258_v34, %v2606_v57 }
 0x66e   :  { %v462_v43 = vmul.f32 %v2260_v37, %v2608_v59 }
 0x6cc   :  { %v564_v35 = vpop.permute.xlu1 %563 }
 0x6cd   :  { %v566_v36 = vmul.f32 %v2258_v34, %v564_v35 }
 0x6ce   :  { %v465_v38 = vpop.permute.xlu0 %464 }
 0x6cf   :  { %568 = vrot.lane.b32.xlu1 %v566_v36, %s2428_s24  ;;  %v467_v39 = vmul.f32 %v2260_v37, %v465_v38 }
 0x6d1   :  { %469 = vrot.lane.b32.xlu0 %v467_v39, %s2428_s24 }
 0x741   :  { %v569_v41 = vpop.permute.xlu1 %568 }
 0x742   :  { %v2653_v42 = vadd.f32 %v569_v41, %v561_v40  ;;  %v890_v41 = vld [vmem:[#allocation2 + $0x8] sm:$0x3] }
 0x743   :  { %v470_v44 = vpop.permute.xlu0 %469 }
 0x744   :  { %2261 = vtanh.f32 %v2653_v42  ;;  %v2657_v45 = vadd.f32 %v470_v44, %v462_v43 }
 0x746   :  { %2263 = vtanh.f32 %v2657_v45 }
 0x751   :  { %v2262_v46 = vpop.eup %2261 }
 0x752   :  { %574 = vrot.lane.b32.xlu1 %v2262_v46, %s2435_s1 }
 0x753   :  { %v2264_v47 = vpop.eup %2263 }
 0x754   :  { %475 = vrot.lane.b32.xlu0 %v2264_v47, %s2435_s1 }
 0x7c4   :  { %v575_v48 = vpop.permute.xlu1 %574 }
 0x7c5   :  { %v577_v49 = vmul.f32 %v2258_v34, %v575_v48 }
 0x7c6   :  { %v476_v50 = vpop.permute.xlu0 %475 }
 0x7c7   :  { %579 = vrot.lane.b32.xlu0 %v577_v49, %s2428_s24  ;;  %v478_v51 = vmul.f32 %v2260_v37, %v476_v50 }
 0x7c9   :  { %583 = vrot.lane.b32.xlu1 %v478_v51, %s2435_s1 }
 0x839   :  { %v580_v52 = vpop.permute.xlu0 %579 }
 0x83a   :  { %2063 = vmatmul.mubr.msk.f32.vlgmr.msra.gmra.mxu0 %vm72_vm1, %v580_v52 }
 0x83b   :  { %2066 = vmatpush3.msra.mxu0 %v2530_v19  ;;  %2081 = vmatprep.mubr.msk.f32.mxu0 %vm2434_vm0, %v2433_v0  ;;  %v584_v53 = vpop.permute.xlu1 %583 }
 0x83c   :  { %2067 = vmatprep.subr.mxu0 %v2433_v0  ;;  %v586_v54 = vsel %vm72_vm1, %v580_v52, %v584_v53 }
 0x83d   :  { %2068 = vmatpush3.msra.mxu0 %v2532_v20  ;;  %2052 = vmatmul.mubr.msk.f32.vlgmr.msra.gmra.mxu1 %vm176_vm2, %v586_v54 }
 0x83e   :  { %2069 = vmatprep.subr.mxu0 %v2433_v0  ;;  %2085 = vmatpush3.msra.mxu1 %v2489_v1 }
 0x83f   :  { %2070 = vmatpush3.msra.mxu0 %v2536_v21  ;;  %2086 = vmatprep.subr.mxu1 %v2433_v0 }
 0x840   :  { %2071 = vmatprep.subr.mxu0 %v2433_v0  ;;  %2087 = vmatpush3.msra.mxu1 %v2494_v2 }
 0x841   :  { %2072 = vmatpush3.msra.mxu0 %v2540_v22  ;;  %2088 = vmatprep.subr.mxu1 %v2433_v0 }
 0x842   :  { %2073 = vmatprep.subr.mxu0 %v2433_v0  ;;  %2089 = vmatpush3.msra.mxu1 %v2501_v3 }
 0x843   :  { %2074 = vmatpush3.msra.mxu0 %v2544_v23  ;;  %2090 = vmatprep.subr.mxu1 %v2433_v0 }
 0x844   :  { %2075 = vmatprep.subr.mxu0 %v2433_v0  ;;  %2091 = vmatpush3.msra.mxu1 %v2508_v4 }
 0x845   :  { %2076 = vmatpush3.msra.mxu0 %v2548_v24  ;;  %2092 = vmatprep.mubr.msk.f32.mxu1 %vm2434_vm0, %v2433_v0 }
 0x846   :  { %2077 = vmatprep.subr.mxu0 %v2433_v0  ;;  %2095 = vmatprep.subr.mxu1 %v2433_v0 }
 0x847   :  { %2078 = vmatpush3.msra.mxu0 %v2552_v26 }
 0x848   :  { %2079 = vmatprep.subr.mxu0 %v2433_v0 }
 0x849   :  { %2080 = vmatpush3.msra.mxu0 %v2559_v27 }
 0x84a   :  { %2114 = vmatprep.subr.mxu0 %v2433_v0 }
 0x8fa   :  { %v754_v56 = vpop.f32.mrf.mxu0 }
 0x8fb   :  { %v758_v57 = vadd.f32 %v754_v56, %v685_v55 }
 0x8fc   :  { %v2064_v58 = vpop.f32.mrf.mxu0 }
 0x8fd   :  { %2265 = vtanh.f32 %v758_v57  ;;  %v656_v59 = vpop.f32.mrf.mxu1  ;;  %v1826_v5 = vmul.f32 -1.442695, %v758_v57 }
 0x8fe   :  { %v657_v60 = vadd.f32 %v2598_v33, %v656_v59 }
 0x8ff   :  { %v2053_v61 = vpop.f32.mrf.mxu1 }
 0x900   :  { %2267 = vtanh.f32 %v657_v60  ;;  %v1824_v6 = vmul.f32 -1.442695, %v657_v60 }
 0x901   :  { %2269 = vpow2.f32 %v1826_v5 }
 0x902   :  { %2271 = vpow2.f32 %v1824_v6 }
 0x90a   :  { %v2266_v62 = vpop.eup %2265 }
 0x90b   :  { %768 = vrot.lane.b32.xlu1 %v2266_v62, %s2435_s1 }
 0x90d   :  { %v2268_v63 = vpop.eup %2267 }
 0x90e   :  { %669 = vrot.lane.b32.xlu0 %v2268_v63, %s2435_s1  ;;  %v2270_v7 = vpop.eup %2269 }
 0x90f   :  { %v762_v8 = vadd.f32 1.0, %v2270_v7  ;;  %v2272_v9 = vpop.eup %2271 }
 0x910   :  { %v663_v10 = vadd.f32 1.0, %v2272_v9 }
 0x911   :  { %2273 = vrcp.f32 %v762_v8 }
 0x912   :  { %2275 = vrcp.f32 %v663_v10 }
 0x91e   :  { %v2274_v11 = vpop.eup %2273 }
 0x91f   :  { %v2276_v14 = vpop.eup %2275  ;;  %v766_v17 = vmul.f32 %v2274_v11, %v2653_v42 }
 0x920   :  { %v667_v28 = vmul.f32 %v2276_v14, %v2657_v45 }
 0x97d   :  { %v769_v12 = vpop.permute.xlu1 %768 }
 0x97e   :  { %v771_v13 = vmul.f32 %v2274_v11, %v769_v12 }
 0x980   :  { %773 = vrot.lane.b32.xlu1 %v771_v13, %s2428_s24  ;;  %v670_v15 = vpop.permute.xlu0 %669 }
 0x981   :  { %v672_v16 = vmul.f32 %v2276_v14, %v670_v15 }
 0x983   :  { %674 = vrot.lane.b32.xlu0 %v672_v16, %s2428_s24 }
 0x9f2   :  { %v774_v18 = vpop.permute.xlu1 %773 }
 0x9f3   :  { %v2701_v25 = vadd.f32 %v774_v18, %v766_v17  ;;  %v1095_v18 = vld [vmem:[#allocation2 + $0xa] sm:$0x3] }
 0x9f5   :  { %2277 = vtanh.f32 %v2701_v25  ;;  %v675_v29 = vpop.permute.xlu0 %674 }
 0x9f6   :  { %v2705_v30 = vadd.f32 %v675_v29, %v667_v28 }
 0x9f8   :  { %2279 = vtanh.f32 %v2705_v30 }
 0xa02   :  { %v2278_v31 = vpop.eup %2277 }
 0xa03   :  { %779 = vrot.lane.b32.xlu1 %v2278_v31, %s2435_s1 }
 0xa05   :  { %v2280_v32 = vpop.eup %2279 }
 0xa06   :  { %680 = vrot.lane.b32.xlu0 %v2280_v32, %s2435_s1 }
 0xa75   :  { %v780_v34 = vpop.permute.xlu1 %779 }
 0xa76   :  { %v782_v35 = vmul.f32 %v2274_v11, %v780_v34 }
 0xa78   :  { %784 = vrot.lane.b32.xlu0 %v782_v35, %s2428_s24  ;;  %v681_v36 = vpop.permute.xlu0 %680 }
 0xa79   :  { %v683_v37 = vmul.f32 %v2276_v14, %v681_v36 }
 0xa7b   :  { %788 = vrot.lane.b32.xlu1 %v683_v37, %s2435_s1 }
 0xaea   :  { %v785_v38 = vpop.permute.xlu0 %784 }
 0xaeb   :  { %2093 = vmatmul.mubr.msk.f32.vlgmr.msra.gmra.mxu1 %vm72_vm1, %v785_v38 }
 0xaec   :  { %2096 = vmatpush3.msra.mxu1 %v2530_v19  ;;  %2111 = vmatprep.mubr.msk.f32.mxu1 %vm2434_vm0, %v2433_v0 }
 0xaed   :  { %2097 = vmatprep.subr.mxu1 %v2433_v0  ;;  %v789_v39 = vpop.permute.xlu1 %788 }
 0xaee   :  { %2098 = vmatpush3.msra.mxu1 %v2532_v20  ;;  %v791_v40 = vsel %vm72_vm1, %v785_v38, %v789_v39 }
 0xaef   :  { %2099 = vmatprep.subr.mxu1 %v2433_v0  ;;  %2082 = vmatmul.mubr.msk.f32.vlgmr.msra.gmra.mxu0 %vm176_vm2, %v791_v40 }
 0xaf0   :  { %2100 = vmatpush3.msra.mxu1 %v2536_v21  ;;  %2115 = vmatpush3.msra.mxu0 %v2489_v1 }
 0xaf1   :  { %2101 = vmatprep.subr.mxu1 %v2433_v0  ;;  %2116 = vmatprep.subr.mxu0 %v2433_v0 }
 0xaf2   :  { %2102 = vmatpush3.msra.mxu1 %v2540_v22  ;;  %2117 = vmatpush3.msra.mxu0 %v2494_v2 }
 0xaf3   :  { %2103 = vmatprep.subr.mxu1 %v2433_v0  ;;  %2118 = vmatprep.subr.mxu0 %v2433_v0 }
 0xaf4   :  { %2104 = vmatpush3.msra.mxu1 %v2544_v23  ;;  %2119 = vmatpush3.msra.mxu0 %v2501_v3 }
 0xaf5   :  { %2105 = vmatprep.subr.mxu1 %v2433_v0  ;;  %2120 = vmatprep.subr.mxu0 %v2433_v0 }
 0xaf6   :  { %2122 = vmatprep.mubr.msk.f32.mxu0 %vm2434_vm0, %v2433_v0  ;;  %2121 = vmatpush3.msra.mxu0 %v2508_v4 }
 0xaf7   :  { %2106 = vmatpush3.msra.mxu1 %v2548_v24  ;;  %2125 = vmatprep.subr.mxu0 %v2433_v0 }
 0xaf8   :  { %2107 = vmatprep.subr.mxu1 %v2433_v0 }
 0xaf9   :  { %2108 = vmatpush3.msra.mxu1 %v2552_v26 }
 0xafa   :  { %2109 = vmatprep.subr.mxu1 %v2433_v0 }
 0xafb   :  { %2110 = vmatpush3.msra.mxu1 %v2559_v27 }
 0xafc   :  { %2144 = vmatprep.subr.mxu1 %v2433_v0 }
 0xbab   :  { %v959_v42 = vpop.f32.mrf.mxu1 }
 0xbac   :  { %v963_v43 = vadd.f32 %v959_v42, %v890_v41 }
 0xbad   :  { %v2094_v44 = vpop.f32.mrf.mxu1 }
 0xbae   :  { %2281 = vtanh.f32 %v963_v43  ;;  %v1830_v50 = vmul.f32 -1.442695, %v963_v43 }
 0xbaf   :  { %v861_v45 = vpop.f32.mrf.mxu0 }
 0xbb0   :  { %v862_v46 = vadd.f32 %v2598_v33, %v861_v45 }
 0xbb1   :  { %v2083_v47 = vpop.f32.mrf.mxu0 }
 0xbb2   :  { %2283 = vtanh.f32 %v862_v46  ;;  %v1828_v51 = vmul.f32 -1.442695, %v862_v46 }
 0xbb3   :  { %2285 = vpow2.f32 %v1830_v50 }
 0xbb4   :  { %2287 = vpow2.f32 %v1828_v51 }
 0xbbb   :  { %v2282_v48 = vpop.eup %2281 }
 0xbbc   :  { %973 = vrot.lane.b32.xlu1 %v2282_v48, %s2435_s1 }
 0xbbf   :  { %v2284_v49 = vpop.eup %2283 }
 0xbc0   :  { %874 = vrot.lane.b32.xlu0 %v2284_v49, %s2435_s1  ;;  %v2286_v52 = vpop.eup %2285 }
 0xbc1   :  { %v967_v53 = vadd.f32 1.0, %v2286_v52  ;;  %v2288_v54 = vpop.eup %2287 }
 0xbc2   :  { %v868_v55 = vadd.f32 1.0, %v2288_v54 }
 0xbc3   :  { %2289 = vrcp.f32 %v967_v53 }
 0xbc4   :  { %2291 = vrcp.f32 %v868_v55 }
 0xbd0   :  { %v2290_v56 = vpop.eup %2289 }
 0xbd1   :  { %v2292_v59 = vpop.eup %2291  ;;  %v971_v62 = vmul.f32 %v2290_v56, %v2701_v25 }
 0xbd2   :  { %v872_v6 = vmul.f32 %v2292_v59, %v2705_v30 }
 0xc2e   :  { %v974_v57 = vpop.permute.xlu1 %973 }
 0xc2f   :  { %v976_v58 = vmul.f32 %v2290_v56, %v974_v57 }
 0xc31   :  { %978 = vrot.lane.b32.xlu1 %v976_v58, %s2428_s24 }
 0xc32   :  { %v875_v60 = vpop.permute.xlu0 %874 }
 0xc33   :  { %v877_v61 = vmul.f32 %v2292_v59, %v875_v60 }
 0xc35   :  { %879 = vrot.lane.b32.xlu0 %v877_v61, %s2428_s24 }
 0xca3   :  { %v979_v63 = vpop.permute.xlu1 %978 }
 0xca4   :  { %v2749_v5 = vadd.f32 %v979_v63, %v971_v62 }
 0xca6   :  { %2293 = vtanh.f32 %v2749_v5 }
 0xca7   :  { %v880_v7 = vpop.permute.xlu0 %879 }
 0xca8   :  { %v2753_v8 = vadd.f32 %v880_v7, %v872_v6 }
 0xcaa   :  { %2295 = vtanh.f32 %v2753_v8 }
 0xcb3   :  { %v2294_v9 = vpop.eup %2293 }
 0xcb4   :  { %984 = vrot.lane.b32.xlu1 %v2294_v9, %s2435_s1 }
 0xcb7   :  { %v2296_v10 = vpop.eup %2295 }
 0xcb8   :  { %885 = vrot.lane.b32.xlu0 %v2296_v10, %s2435_s1 }
 0xd26   :  { %v985_v11 = vpop.permute.xlu1 %984 }
 0xd27   :  { %v987_v12 = vmul.f32 %v2290_v56, %v985_v11 }
 0xd29   :  { %989 = vrot.lane.b32.xlu0 %v987_v12, %s2428_s24 }
 0xd2a   :  { %v886_v13 = vpop.permute.xlu0 %885 }
 0xd2b   :  { %v888_v14 = vmul.f32 %v2292_v59, %v886_v13 }
 0xd2d   :  { %993 = vrot.lane.b32.xlu1 %v888_v14, %s2435_s1 }
 0xd9b   :  { %v990_v15 = vpop.permute.xlu0 %989 }
 0xd9c   :  { %2123 = vmatmul.mubr.msk.f32.vlgmr.msra.gmra.mxu0 %vm72_vm1, %v990_v15 }
 0xd9d   :  { %2126 = vmatpush3.msra.mxu0 %v2530_v19  ;;  %2141 = vmatprep.mubr.msk.f32.mxu0 %vm2434_vm0, %v2433_v0 }
 0xd9e   :  { %2127 = vmatprep.subr.mxu0 %v2433_v0 }
 0xd9f   :  { %2128 = vmatpush3.msra.mxu0 %v2532_v20  ;;  %v994_v16 = vpop.permute.xlu1 %993 }
 0xda0   :  { %2129 = vmatprep.subr.mxu0 %v2433_v0  ;;  %v996_v17 = vsel %vm72_vm1, %v990_v15, %v994_v16 }
 0xda1   :  { %2130 = vmatpush3.msra.mxu0 %v2536_v21  ;;  %2112 = vmatmul.mubr.msk.f32.vlgmr.msra.gmra.mxu1 %vm176_vm2, %v996_v17 }
 0xda2   :  { %2131 = vmatprep.subr.mxu0 %v2433_v0  ;;  %2145 = vmatpush3.msra.mxu1 %v2489_v1 }
 0xda3   :  { %2132 = vmatpush3.msra.mxu0 %v2540_v22  ;;  %2146 = vmatprep.subr.mxu1 %v2433_v0 }
 0xda4   :  { %2133 = vmatprep.subr.mxu0 %v2433_v0  ;;  %2147 = vmatpush3.msra.mxu1 %v2494_v2 }
 0xda5   :  { %2134 = vmatpush3.msra.mxu0 %v2544_v23  ;;  %2148 = vmatprep.subr.mxu1 %v2433_v0 }
 0xda6   :  { %2152 = vmatprep.mubr.msk.f32.mxu1 %vm2434_vm0, %v2433_v0  ;;  %2149 = vmatpush3.msra.mxu1 %v2501_v3 }
 0xda7   :  { %2135 = vmatprep.subr.mxu0 %v2433_v0  ;;  %2150 = vmatprep.subr.mxu1 %v2433_v0 }
 0xda8   :  { %2136 = vmatpush3.msra.mxu0 %v2548_v24  ;;  %2151 = vmatpush3.msra.mxu1 %v2508_v4 }
 0xda9   :  { %2137 = vmatprep.subr.mxu0 %v2433_v0  ;;  %2155 = vmatprep.subr.mxu1 %v2433_v0 }
 0xdaa   :  { %2138 = vmatpush3.msra.mxu0 %v2552_v26 }
 0xdab   :  { %2139 = vmatprep.subr.mxu0 %v2433_v0 }
 0xdac   :  { %2140 = vmatpush3.msra.mxu0 %v2559_v27 }
 0xdad   :  { %2174 = vmatprep.subr.mxu0 %v2433_v0 }
 0xe5c   :  { %v1164_v25 = vpop.f32.mrf.mxu0 }
 0xe5d   :  { %v1168_v28 = vadd.f32 %v1164_v25, %v1095_v18 }
 0xe5e   :  { %v2124_v29 = vpop.f32.mrf.mxu0 }
 0xe5f   :  { %2297 = vtanh.f32 %v1168_v28  ;;  %v1834_v36 = vmul.f32 -1.442695, %v1168_v28 }
 0xe61   :  { %v1066_v30 = vpop.f32.mrf.mxu1 }
 0xe62   :  { %v1067_v31 = vadd.f32 %v2598_v33, %v1066_v30 }
 0xe63   :  { %v2113_v32 = vpop.f32.mrf.mxu1 }
 0xe64   :  { %2299 = vtanh.f32 %v1067_v31  ;;  %v1832_v37 = vmul.f32 -1.442695, %v1067_v31 }
 0xe65   :  { %2301 = vpow2.f32 %v1834_v36  ;;  %v2353_v36 = vld [vmem:[#allocation5 + $0x38] sm:$0xff] }
 0xe66   :  { %2303 = vpow2.f32 %v1832_v37  ;;  %v2354_v37 = vld [vmem:[#allocation5 + $0x30] sm:$0xff] }
 0xe6c   :  { %v2298_v34 = vpop.eup %2297 }
 0xe6d   :  { %1178 = vrot.lane.b32.xlu1 %v2298_v34, %s2435_s1 }
 0xe71   :  { %v2300_v35 = vpop.eup %2299 }
 0xe72   :  { %1079 = vrot.lane.b32.xlu0 %v2300_v35, %s2435_s1  ;;  %v2302_v38 = vpop.eup %2301 }
 0xe73   :  { %v1172_v39 = vadd.f32 1.0, %v2302_v38  ;;  %v2304_v40 = vpop.eup %2303  ;;  %v2355_v38 = vld [vmem:[#allocation5 + $0x28] sm:$0xff] }
 0xe74   :  { %v1073_v41 = vadd.f32 1.0, %v2304_v40 }
 0xe75   :  { %2305 = vrcp.f32 %v1172_v39 }
 0xe76   :  { %2307 = vrcp.f32 %v1073_v41  ;;  %v2356_v41 = vld [vmem:[#allocation5 + $0x20] sm:$0xff] }
 0xe82   :  { %v2306_v42 = vpop.eup %2305 }
 0xe83   :  { %v2308_v45 = vpop.eup %2307  ;;  %v1176_v48 = vmul.f32 %v2306_v42, %v2749_v5 }
 0xe84   :  { %v1077_v51 = vmul.f32 %v2308_v45, %v2753_v8 }
 0xedf   :  { %v1179_v43 = vpop.permute.xlu1 %1178 }
 0xee0   :  { %v1181_v44 = vmul.f32 %v2306_v42, %v1179_v43  ;;  %v2358_v43 = vld [vmem:[#allocation5 + $0x10] sm:$0xff] }
 0xee2   :  { %1183 = vrot.lane.b32.xlu1 %v1181_v44, %s2428_s24  ;;  %v2359_v44 = vld [vmem:[#allocation5 + $0x8] sm:$0xff] }
 0xee4   :  { %v1080_v46 = vpop.permute.xlu0 %1079 }
 0xee5   :  { %v1082_v47 = vmul.f32 %v2308_v45, %v1080_v46 }
 0xee7   :  { %1084 = vrot.lane.b32.xlu0 %v1082_v47, %s2428_s24 }
 0xf54   :  { %v1184_v49 = vpop.permute.xlu1 %1183 }
 0xf55   :  { %v2797_v50 = vadd.f32 %v1184_v49, %v1176_v48 }
 0xf57   :  { %2309 = vtanh.f32 %v2797_v50 }
 0xf59   :  { %v1085_v52 = vpop.permute.xlu0 %1084 }
 0xf5a   :  { %v2801_v53 = vadd.f32 %v1085_v52, %v1077_v51 }
 0xf5c   :  { %2311 = vtanh.f32 %v2801_v53 }
 0xf64   :  { %v2310_v54 = vpop.eup %2309 }
 0xf65   :  { %1189 = vrot.lane.b32.xlu1 %v2310_v54, %s2435_s1 }
 0xf69   :  { %v2312_v55 = vpop.eup %2311 }
 0xf6a   :  { %1090 = vrot.lane.b32.xlu0 %v2312_v55, %s2435_s1 }
 0xfd7   :  { %v1190_v56 = vpop.permute.xlu1 %1189 }
 0xfd8   :  { %v1192_v57 = vmul.f32 %v2306_v42, %v1190_v56  ;;  %v2357_v42 = vld [vmem:[#allocation5 + $0x18] sm:$0xff] }
 0xfda   :  { %1194 = vrot.lane.b32.xlu0 %v1192_v57, %s2428_s24 }
 0xfdc   :  { %v1091_v58 = vpop.permute.xlu0 %1090 }
 0xfdd   :  { %v1093_v59 = vmul.f32 %v2308_v45, %v1091_v58  ;;  %v1505_v45 = vld [vmem:[#allocation2 + $0xe] sm:$0x3] }
 0xfdf   :  { %1198 = vrot.lane.b32.xlu1 %v1093_v59, %s2435_s1 }
0x104c   :  { %v1195_v60 = vpop.permute.xlu0 %1194 }
0x104d   :  { %2153 = vmatmul.mubr.msk.f32.vlgmr.msra.gmra.mxu1 %vm72_vm1, %v1195_v60 }
0x104e   :  { %2156 = vmatpush3.msra.mxu1 %v2530_v19  ;;  %2171 = vmatprep.mubr.msk.f32.mxu1 %vm2434_vm0, %v2433_v0 }
0x104f   :  { %2157 = vmatprep.subr.mxu1 %v2433_v0 }
0x1050   :  { %2158 = vmatpush3.msra.mxu1 %v2532_v20 }
0x1051   :  { %2159 = vmatprep.subr.mxu1 %v2433_v0  ;;  %v1199_v61 = vpop.permute.xlu1 %1198 }
0x1052   :  { %2160 = vmatpush3.msra.mxu1 %v2536_v21  ;;  %v1201_v62 = vsel %vm72_vm1, %v1195_v60, %v1199_v61 }
0x1053   :  { %2161 = vmatprep.subr.mxu1 %v2433_v0  ;;  %2142 = vmatmul.mubr.msk.f32.vlgmr.msra.gmra.mxu0 %vm176_vm2, %v1201_v62 }
0x1054   :  { %2162 = vmatpush3.msra.mxu1 %v2540_v22  ;;  %2175 = vmatpush3.msra.mxu0 %v2489_v1  ;;  %v1300_v1 = vld [vmem:[#allocation2 + $0xc] sm:$0x3] }
0x1055   :  { %2163 = vmatprep.subr.mxu1 %v2433_v0  ;;  %2176 = vmatprep.subr.mxu0 %v2433_v0 }
0x1056   :  { %2182 = vmatprep.mubr.msk.f32.mxu0 %vm2434_vm0, %v2433_v0  ;;  %2177 = vmatpush3.msra.mxu0 %v2494_v2 }
0x1057   :  { %2164 = vmatpush3.msra.mxu1 %v2544_v23  ;;  %2178 = vmatprep.subr.mxu0 %v2433_v0 }
0x1058   :  { %2165 = vmatprep.subr.mxu1 %v2433_v0  ;;  %2179 = vmatpush3.msra.mxu0 %v2501_v3 }
0x1059   :  { %2166 = vmatpush3.msra.mxu1 %v2548_v24  ;;  %2180 = vmatprep.subr.mxu0 %v2433_v0 }
0x105a   :  { %2167 = vmatprep.subr.mxu1 %v2433_v0  ;;  %2181 = vmatpush3.msra.mxu0 %v2508_v4 }
0x105b   :  { %2168 = vmatpush3.msra.mxu1 %v2552_v26  ;;  %2185 = vmatprep.subr.mxu0 %v2433_v0 }
0x105c   :  { %2169 = vmatprep.subr.mxu1 %v2433_v0 }
0x105d   :  { %2170 = vmatpush3.msra.mxu1 %v2559_v27 }
0x105e   :  { %2204 = vmatprep.subr.mxu1 %v2433_v0 }
0x110d   :  { %v1369_v2 = vpop.f32.mrf.mxu1 }
0x110e   :  { %v1373_v3 = vadd.f32 %v1369_v2, %v1300_v1 }
0x110f   :  { %v2154_v19 = vpop.f32.mrf.mxu1 }
0x1110   :  { %2313 = vtanh.f32 %v1373_v3  ;;  %v1838_v24 = vmul.f32 -1.442695, %v1373_v3 }
0x1113   :  { %v1271_v20 = vpop.f32.mrf.mxu0 }
0x1114   :  { %v1272_v21 = vadd.f32 %v2598_v33, %v1271_v20 }
0x1115   :  { %v2143_v22 = vpop.f32.mrf.mxu0 }
0x1116   :  { %2315 = vtanh.f32 %v1272_v21  ;;  %v1836_v26 = vmul.f32 -1.442695, %v1272_v21 }
0x1117   :  { %2317 = vpow2.f32 %v1838_v24 }
0x1118   :  { %2319 = vpow2.f32 %v1836_v26 }
0x111d   :  { %v2314_v4 = vpop.eup %2313 }
0x111e   :  { %1383 = vrot.lane.b32.xlu1 %v2314_v4, %s2435_s1 }
0x1123   :  { %v2316_v23 = vpop.eup %2315 }
0x1124   :  { %1284 = vrot.lane.b32.xlu0 %v2316_v23, %s2435_s1  ;;  %v2318_v63 = vpop.eup %2317 }
0x1125   :  { %v1377_v5 = vadd.f32 1.0, %v2318_v63  ;;  %v2320_v6 = vpop.eup %2319 }
0x1126   :  { %v1278_v7 = vadd.f32 1.0, %v2320_v6 }
0x1127   :  { %2321 = vrcp.f32 %v1377_v5 }
0x1128   :  { %2323 = vrcp.f32 %v1278_v7 }
0x1134   :  { %v2322_v8 = vpop.eup %2321 }
0x1135   :  { %v2324_v11 = vpop.eup %2323  ;;  %v1381_v14 = vmul.f32 %v2322_v8, %v2797_v50 }
0x1136   :  { %v1282_v17 = vmul.f32 %v2324_v11, %v2801_v53 }
0x1190   :  { %v1384_v9 = vpop.permute.xlu1 %1383 }
0x1191   :  { %v1386_v10 = vmul.f32 %v2322_v8, %v1384_v9 }
0x1193   :  { %1388 = vrot.lane.b32.xlu1 %v1386_v10, %s2428_s24  ;;  %v2360_v10 = vld [vmem:[%s2916_s3] ss:$0 sm:$0xff] }
0x1196   :  { %v1285_v12 = vpop.permute.xlu0 %1284 }
0x1197   :  { %v1287_v13 = vmul.f32 %v2324_v11, %v1285_v12 }
0x1199   :  { %1289 = vrot.lane.b32.xlu0 %v1287_v13, %s2428_s24 }
0x1205   :  { %v1389_v15 = vpop.permute.xlu1 %1388 }
0x1206   :  { %v2845_v16 = vadd.f32 %v1389_v15, %v1381_v14 }
0x1208   :  { %2325 = vtanh.f32 %v2845_v16 }
0x120b   :  { %v1290_v18 = vpop.permute.xlu0 %1289 }
0x120c   :  { %v2849_v25 = vadd.f32 %v1290_v18, %v1282_v17 }
0x120e   :  { %2327 = vtanh.f32 %v2849_v25 }
0x1215   :  { %v2326_v28 = vpop.eup %2325 }
0x1216   :  { %1394 = vrot.lane.b32.xlu1 %v2326_v28, %s2435_s1 }
0x121b   :  { %v2328_v29 = vpop.eup %2327 }
0x121c   :  { %1295 = vrot.lane.b32.xlu0 %v2328_v29, %s2435_s1 }
0x1288   :  { %v1395_v30 = vpop.permute.xlu1 %1394 }
0x1289   :  { %v1397_v31 = vmul.f32 %v2322_v8, %v1395_v30 }
0x128b   :  { %1399 = vrot.lane.b32.xlu0 %v1397_v31, %s2428_s24  ;;  %v1712_v31 = vld [vmem:[%s2917_s4 + $0x18] sm:$0xff] }
0x128e   :  { %v1296_v32 = vpop.permute.xlu0 %1295 }
0x128f   :  { %v1298_v34 = vmul.f32 %v2324_v11, %v1296_v32  ;;  %v1711_v32 = vld [vmem:[%s2917_s4 + $0x10] sm:$0xff] }
0x1291   :  { %1403 = vrot.lane.b32.xlu1 %v1298_v34, %s2435_s1  ;;  %v1710_v34 = vld [vmem:[%s2917_s4 + $0x8] sm:$0xff] }
0x12fd   :  { %v1400_v35 = vpop.permute.xlu0 %1399 }
0x12fe   :  { %2183 = vmatmul.mubr.msk.f32.vlgmr.msra.gmra.mxu0 %vm72_vm1, %v1400_v35 }
0x12ff   :  { %2186 = vmatpush3.msra.mxu0 %v2353_v36  ;;  %2201 = vmatprep.mubr.msk.f32.mxu0 %vm2434_vm0, %v2433_v0 }
0x1300   :  { %2187 = vmatprep.subr.mxu0 %v2433_v0 }
0x1301   :  { %2188 = vmatpush3.msra.mxu0 %v2354_v37 }
0x1302   :  { %2189 = vmatprep.subr.mxu0 %v2433_v0 }
0x1303   :  { %2190 = vmatpush3.msra.mxu0 %v2355_v38  ;;  %v1404_v39 = vpop.permute.xlu1 %1403 }
0x1304   :  { %2191 = vmatprep.subr.mxu0 %v2433_v0  ;;  %v1406_v40 = vsel %vm72_vm1, %v1400_v35, %v1404_v39  ;;  %v1709_v35 = vld [vmem:[%s2917_s4] sm:$0xff]  ;;  %s1803_s4 = sshll.u32 %s2436_s7, 4  ;;  %s1804_s4 = int_to_ptr.vmem [resolvable:$true] %s1803_s4 }
0x1305   :  { %2192 = vmatpush3.msra.mxu0 %v2356_v41  ;;  %2172 = vmatmul.mubr.msk.f32.vlgmr.msra.gmra.mxu1 %vm176_vm2, %v1406_v40  ;;  %v1845_v40 = vld [vmem:[%s2918_s5] ss:$0 sm:$0xff]  ;;  %s2401_s8 = scalar_lea.vmem %s1804_s4, 32  ;;  %p2406_p11 = scmp.lt.s32.totalorder %s1804_s4, %s1804_s4 }
0x1306   :  { %2193 = vmatprep.subr.mxu0 %v2433_v0  ;;  %2212 = vmatprep.mubr.msk.f32.mxu1 %vm2434_vm0, %v2433_v0  ;;  %p2402_p10 = scmp.ne.s32.totalorder %s1804_s4, %s2401_s8  ;;  %p2407_p12 = scmp.lt.s32.totalorder %s2401_s8, %s2401_s8 }
0x1307   :  { %2194 = vmatpush3.msra.mxu0 %v2357_v42  ;;  %2205 = vmatpush3.msra.mxu1 %v1712_v31 }
0x1308   :  { %2195 = vmatprep.subr.mxu0 %v2433_v0  ;;  %2206 = vmatprep.subr.mxu1 %v2433_v0  ;;  %p2408_p13 = por %p2407_p12, %p2406_p11 }
0x1309   :  { %2196 = vmatpush3.msra.mxu0 %v2358_v43  ;;  %2207 = vmatpush3.msra.mxu1 %v1711_v32 }
0x130a   :  { %2197 = vmatprep.subr.mxu0 %v2433_v0  ;;  %2208 = vmatprep.subr.mxu1 %v2433_v0  ;;  %p2409_p0 = pnand %p2408_p13, %p2402_p10 }
0x130b   :  { %2198 = vmatpush3.msra.mxu0 %v2359_v44  ;;  %2209 = vmatpush3.msra.mxu1 %v1710_v34 }
0x130c   :  { %2199 = vmatprep.subr.mxu0 %v2433_v0  ;;  %2210 = vmatprep.subr.mxu1 %v2433_v0 }
0x130d   :  { %2200 = vmatpush3.msra.mxu0 %v2559_v27  ;;  %2211 = vmatpush3.msra.mxu1 %v1709_v35 }
0x13be   :  { %v1574_v46 = vpop.f32.mrf.mxu0 }
0x13bf   :  { %v1578_v47 = vadd.f32 %v1574_v46, %v1505_v45 }
0x13c0   :  { %v2184_v48 = vpop.f32.mrf.mxu0 }
0x13c1   :  { %2329 = vtanh.f32 %v1578_v47  ;;  %v1842_v54 = vmul.f32 -1.442695, %v1578_v47 }
0x13c5   :  { %v1476_v49 = vpop.f32.mrf.mxu1 }
0x13c6   :  { %v1477_v50 = vadd.f32 %v2598_v33, %v1476_v49 }
0x13c7   :  { %v2173_v51 = vpop.f32.mrf.mxu1 }
0x13c8   :  { %2331 = vtanh.f32 %v1477_v50  ;;  %v1840_v55 = vmul.f32 -1.442695, %v1477_v50 }
0x13c9   :  { %2333 = vpow2.f32 %v1842_v54 }
0x13ca   :  { %2335 = vpow2.f32 %v1840_v55 }
0x13ce   :  { %v2330_v52 = vpop.eup %2329 }
0x13cf   :  { %1588 = vrot.lane.b32.xlu1 %v2330_v52, %s2435_s1 }
0x13d5   :  { %v2332_v53 = vpop.eup %2331 }
0x13d6   :  { %1489 = vrot.lane.b32.xlu0 %v2332_v53, %s2435_s1  ;;  %v2334_v27 = vpop.eup %2333 }
0x13d7   :  { %v1582_v56 = vadd.f32 1.0, %v2334_v27  ;;  %v2336_v57 = vpop.eup %2335 }
0x13d8   :  { %v1483_v58 = vadd.f32 1.0, %v2336_v57 }
0x13d9   :  { %2337 = vrcp.f32 %v1582_v56 }
0x13da   :  { %2339 = vrcp.f32 %v1483_v58 }
0x13e6   :  { %v2338_v59 = vpop.eup %2337 }
0x13e7   :  { %v2340_v61 = vpop.eup %2339  ;;  %v1586_v2 = vmul.f32 %v2338_v59, %v2845_v16 }
0x13e8   :  { %v1487_v20 = vmul.f32 %v2340_v61, %v2849_v25 }
0x1441   :  { %v1589_v33 = vpop.permute.xlu1 %1588 }
0x1442   :  { %v1591_v60 = vmul.f32 %v2338_v59, %v1589_v33 }
0x1444   :  { %1593 = vrot.lane.b32.xlu1 %v1591_v60, %s2428_s24 }
0x1448   :  { %v1490_v62 = vpop.permute.xlu0 %1489 }
0x1449   :  { %v1492_v1 = vmul.f32 %v2340_v61, %v1490_v62 }
0x144b   :  { %1494 = vrot.lane.b32.xlu0 %v1492_v1, %s2428_s24 }
0x14b6   :  { %v1594_v3 = vpop.permute.xlu1 %1593 }
0x14b7   :  { %v1596_v19 = vadd.f32 %v1594_v3, %v1586_v2 }
0x14b9   :  { %2341 = vtanh.f32 %v1596_v19 }
0x14bd   :  { %v1495_v21 = vpop.permute.xlu0 %1494 }
0x14be   :  { %v1497_v22 = vadd.f32 %v1495_v21, %v1487_v20 }
0x14c0   :  { %2343 = vtanh.f32 %v1497_v22 }
0x14c6   :  { %v2342_v4 = vpop.eup %2341 }
0x14c7   :  { %1599 = vrot.lane.b32.xlu1 %v2342_v4, %s2435_s1 }
0x14cd   :  { %v2344_v23 = vpop.eup %2343 }
0x14ce   :  { %1500 = vrot.lane.b32.xlu0 %v2344_v23, %s2435_s1 }
0x1539   :  { %v1600_v24 = vpop.permute.xlu1 %1599 }
0x153a   :  { %v1602_v26 = vmul.f32 %v2338_v59, %v1600_v24 }
0x153c   :  { %1604 = vrot.lane.b32.xlu0 %v1602_v26, %s2428_s24 }
0x1540   :  { %v1501_v63 = vpop.permute.xlu0 %1500 }
0x1541   :  { %v1503_v5 = vmul.f32 %v2340_v61, %v1501_v63 }
0x1543   :  { %1608 = vrot.lane.b32.xlu1 %v1503_v5, %s2435_s1 }
0x15ae   :  { %v1605_v6 = vpop.permute.xlu0 %1604 }
0x15b5   :  { %v1609_v7 = vpop.permute.xlu1 %1608 }
0x15b6   :  { %v1611_v8 = vsel %vm72_vm1, %v1605_v6, %v1609_v7 }
0x15b7   :  { %2202 = vmatmul.mubr.msk.f32.vlgmr.msra.gmra.mxu0 %vm176_vm2, %v1611_v8 }
0x1677   :  { %v1681_v9 = vpop.f32.mrf.mxu0 }
0x1678   :  { %v1682_v11 = vadd.f32 %v2360_v10, %v1681_v9 }
0x1679   :  { %v2203_v12 = vpop.f32.mrf.mxu0 }
0x167a   :  { %2345 = vtanh.f32 %v1682_v11  ;;  %v1844_v14 = vmul.f32 -1.442695, %v1682_v11 }
0x167c   :  { %2347 = vpow2.f32 %v1844_v14 }
0x1687   :  { %v2346_v13 = vpop.eup %2345 }
0x1688   :  { %1694 = vrot.lane.b32.xlu0 %v2346_v13, %s2435_s1 }
0x1689   :  { %v2348_v15 = vpop.eup %2347 }
0x168a   :  { %v1688_v16 = vadd.f32 1.0, %v2348_v15 }
0x168c   :  { %2349 = vrcp.f32 %v1688_v16 }
0x1699   :  { %v2350_v17 = vpop.eup %2349 }
0x169a   :  { %v1692_v28 = vmul.f32 %v2350_v17, %v1497_v22 }
0x16fa   :  { %v1695_v18 = vpop.permute.xlu0 %1694 }
0x16fb   :  { %v1697_v25 = vmul.f32 %v2350_v17, %v1695_v18 }
0x16fd   :  { %1699 = vrot.lane.b32.xlu1 %v1697_v25, %s2428_s24 }
0x176f   :  { %v1700_v29 = vpop.permute.xlu1 %1699 }
0x1770   :  { %v1702_v30 = vadd.f32 %v1700_v29, %v1692_v28 }
0x1772   :  { %2351 = vtanh.f32 %v1702_v30 }
0x177f   :  { %v2352_v36 = vpop.eup %2351 }
0x1780   :  { %1705 = vrot.lane.b32.xlu0 %v2352_v36, %s2435_s1 }
0x17f2   :  { %v1706_v37 = vpop.permute.xlu0 %1705 }
0x17f3   :  { %v1708_v38 = vmul.f32 %v2350_v17, %v1706_v37 }
0x17f5   :  { %1721 = vrot.lane.b32.xlu1 %v1708_v38, %s2428_s24 }
0x1867   :  { %v1722_v39 = vpop.permute.xlu1 %1721 }
0x1868   :  { %2213 = vmatmul.mubr.msk.f32.vlgmr.msra.gmra.mxu1 %vm72_vm1, %v1722_v39 }
0x1928   :  { %v1791_v41 = vpop.f32.mrf.mxu1 }
0x1929   :  { %v1792_v0 = vadd.f32 %v1845_v40, %v1791_v41 }
0x192a   :  { %v2214_v42 = vpop.f32.mrf.mxu1 }
0x192b   :  { %1796 = vst.msk [vmem:[#allocation7] sm:$0x3] %vm1795_vm3, %v1792_v0 }
0x192c   :  { %2412 = shalt.err (!%p2409_p0)
}
0x192d   :  { %1806 = dma.vmem_to_hbm [thread:$0]  %s1804_s4, 32, %s2919_s6, [#allocation4]  }
0x192e   :  { %2425 = dma.done.wait [#allocation4], 32  }
0x192f   :  { %2426 = vsyncadd [#allocation4], 4294967264 }
0x1930   :  { %1810 = vsyncpa [#allocation3], 1 }
0x1931   :  { %1811 = vsyncpa [#allocation6], 1 }
0x1932   :  { %1812 = vsyncpa [#allocation4], 1 }

</bundles_post_ra>
